<compile_context>
chip_gen: v6e
topology: v6e:2x2x1
jax: 0.10.0
libtpu: 0.0.40
codegen_flags: <defaults>
</compile_context>

<pallas_src>
import jax
import jax.numpy as jnp
from jax.experimental import pallas as pl
from jax.experimental.pallas import tpu as pltpu


# --------------------------- parameter slab layout ---------------------------
def _slab_layout(input_dim, hidden_dim):
    """Row offsets of each packed parameter inside the single (rows, 4H) slab.

    Matmul operands (layer-1 weight halves, whh0, wih0) start on 8-row
    (sublane) aligned offsets so the in-kernel static slices need no relayout.
    """
    H = hidden_dim
    lanes = 4 * H                              # 128 for H=32
    r_w1 = 0                                   # (2H, 4H) stacked layer-1 weight
    r_b1 = 2 * H                               # (1, 4H)  all layer-1 biases
    r_b0 = r_b1 + 1                            # (1, 3H)  layer-0 input-proj bias
    r_ghb0 = r_b0 + 1                          # (1, 3H)  [0 | 0 | b_hn0]
    r_head = r_ghb0 + 1                        # (1, H+1) [out_w | out_b]
    r_whh0 = -(-(r_head + 1) // 8) * 8         # (H, 3H), sublane aligned
    r_wih0 = r_whh0 + H                        # (D, 3H)  (H multiple of 8)
    rows = -(-(r_wih0 + input_dim) // 8) * 8
    return dict(lanes=lanes, w1=r_w1, b1=r_b1, b0=r_b0, ghb0=r_ghb0,
                head=r_head, whh0=r_whh0, wih0=r_wih0, rows=rows)


# --------------------------- fused forward kernel ----------------------------
def make_fused_kernel(B, T, D, H):
    """Single-invocation kernel: interleaved 2-layer GRU -> Linear -> MSE."""
    L = _slab_layout(D, H)
    H2, H3 = 2 * H, 3 * H
    f32 = jnp.float32

    def kernel(x_ref, y_ref, p_ref, loss_ref, result_ref):
        # ---- carve parameters out of the single slab (static, aligned views)
        w1i = p_ref[L["w1"]:L["w1"] + H, :]               # (H, 4H) layer-1 input half
        w1h = p_ref[L["w1"] + H:L["w1"] + H2, :]          # (H, 4H) layer-1 recurrent half
        b1 = p_ref[L["b1"]:L["b1"] + 1, :]                # (1, 4H) [br|bz|b_in|b_hn]
        b0 = p_ref[L["b0"]:L["b0"] + 1, 0:H3]             # (1, 3H) folded input bias
        ghb0 = p_ref[L["ghb0"]:L["ghb0"] + 1, 0:H3]       # (1, 3H) [0|0|b_hn0]
        w_out = p_ref[L["head"]:L["head"] + 1, 0:H]       # (1, H)
        b_out = p_ref[L["head"]:L["head"] + 1, H:H + 1]   # (1, 1)
        whh0 = p_ref[L["whh0"]:L["whh0"] + H, 0:H3]       # (H, 3H)
        wih0 = p_ref[L["wih0"]:L["wih0"] + D, 0:H3]       # (D, 3H)

        # ---- hoisted layer-0 input projection (one matmul per batch row-block,
        #      biases already folded).  Independent of the recurrence.
        gi0 = [jnp.dot(x_ref[b], wih0, preferred_element_type=f32) + b0
               for b in range(B)]                          # B x (T, 3H)

        # TODO(synk): nn.GRU inter-layer dropout(p=0.1) is training-only;
        # eval semantics (no-op) implemented here.

        h0 = jnp.zeros((B, H), f32)
        h1 = jnp.zeros((B, H), f32)
        for t in range(T):                    # fully unrolled at trace time
            # ----- layer 0, step t (serial critical path) -----
            g0 = jnp.concatenate([g[t:t + 1, :] for g in gi0], axis=0)  # (B, 3H)
            if t == 0:
                gh0 = ghb0                                 # h0 == 0
            else:
                gh0 = jnp.dot(h0, whh0, preferred_element_type=f32) + ghb0
            rz0 = jax.nn.sigmoid(g0[:, :H2] + gh0[:, :H2])  # fused r|z sigmoid
            n0 = jnp.tanh(g0[:, H2:] + rz0[:, :H] * gh0[:, H2:])
            h0 = n0 + rz0[:, H:] * (h0 - n0)

            # ----- layer 1, step t (overlaps layer-0 step t+1) -----
            if t == 0:
                g1 = jnp.dot(h0, w1i, preferred_element_type=f32) + b1
            else:
                g1 = (jnp.dot(h0, w1i, preferred_element_type=f32)
                      + jnp.dot(h1, w1h, preferred_element_type=f32) + b1)
            rz1 = jax.nn.sigmoid(g1[:, :H2])
            n1 = jnp.tanh(g1[:, H2:H3] + rz1[:, :H] * g1[:, H3:])
            h1 = n1 + rz1[:, H:] * (h1 - n1)

        # ---- head: Linear(H, 1) + MSE loss, fused into the same kernel.
        res = jnp.sum(h1 * w_out, axis=-1, keepdims=True) + b_out   # (B, 1)
        result_ref[...] = res
        diff = res - y_ref[...]
        loss_ref[...] = jnp.mean(diff * diff, keepdims=True)        # (1, 1)

    return kernel


# ------------------------------- forward pass --------------------------------
@jax.jit
def example_regression_forward(features, labels, param_slab):
    # features: (B, T, D) batch_first, labels: (B, 1), param_slab: (rows, 4H)
    B, T, D = features.shape
    H = param_slab.shape[1] // 4

    x = features.astype(jnp.float32)      # passed as-is; no host transpose
    y = labels.astype(jnp.float32)

    vmem = pl.BlockSpec(memory_space=pltpu.MemorySpace.VMEM)
    loss, result = pl.pallas_call(
        make_fused_kernel(B, T, D, H),
        out_shape=(jax.ShapeDtypeStruct((1, 1), jnp.float32),
                   jax.ShapeDtypeStruct((B, 1), jnp.float32)),
        in_specs=[vmem, vmem, vmem],
        out_specs=(vmem, vmem),
    )(x, y, param_slab)

    correct = jnp.array([1], jnp.int32)
    valid = jnp.array([1], jnp.int32)
    return loss[0, 0], result, correct, valid


# ------------------------------ parameter setup ------------------------------
def init_params(key, input_dim, hidden_dim):
    """Raw PyTorch-layout GRU/Linear params + the packed kernel slab."""
    H = hidden_dim
    k = 1.0 / jnp.sqrt(jnp.float32(H))

    def unif(kk, shape):
        return jax.random.uniform(kk, shape, jnp.float32, -k, k)

    keys = jax.random.split(key, 10)
    raw = {}
    for layer, d_in, k0 in ((0, input_dim, 0), (1, hidden_dim, 4)):
        raw[f"l{layer}"] = {
            "w_ih": unif(keys[k0 + 0], (3 * H, d_in)),   # gate order (r, z, n)
            "w_hh": unif(keys[k0 + 1], (3 * H, H)),
            "b_ih": unif(keys[k0 + 2], (3 * H,)),
            "b_hh": unif(keys[k0 + 3], (3 * H,)),
        }
    raw["out_w"] = unif(keys[8], (1, hidden_dim))        # Linear weight (out, in)
    raw["out_b"] = unif(keys[9], (1,))
    return raw, pack_params(raw, input_dim, H)


def pack_params(raw, input_dim, hidden_dim):
    """Pack every parameter into one lane-dense f32 slab (see _slab_layout)."""
    D, H = input_dim, hidden_dim
    f32 = jnp.float32
    L = _slab_layout(D, H)
    l0, l1 = raw["l0"], raw["l1"]

    # Layer 1: gate-stacked (2H, 4H) weight, columns [r | z | i_n | h_n],
    # split into an input half (rows 0:H) and a recurrent half (rows H:2H).
    wih1, whh1 = l1["w_ih"], l1["w_hh"]                  # (3H, H) each
    zeros_hh = jnp.zeros((H, H), f32)
    w1_in = jnp.concatenate(
        [wih1[:H].T, wih1[H:2 * H].T, wih1[2 * H:].T, zeros_hh], axis=1)
    w1_hid = jnp.concatenate(
        [whh1[:H].T, whh1[H:2 * H].T, zeros_hh, whh1[2 * H:].T], axis=1)
    b1 = jnp.concatenate([l1["b_ih"][:2 * H] + l1["b_hh"][:2 * H],
                          l1["b_ih"][2 * H:], l1["b_hh"][2 * H:]])   # (4H,)

    # Layer 0: fold r/z recurrent biases into the hoisted projection bias;
    # keep b_hn on the recurrent side (needed inside r * (gh_n + b_hn)).
    b0 = l0["b_ih"] + jnp.concatenate([l0["b_hh"][:2 * H], jnp.zeros((H,), f32)])
    ghb0 = jnp.concatenate([jnp.zeros((2 * H,), f32), l0["b_hh"][2 * H:]])
    head = jnp.concatenate([raw["out_w"][0], raw["out_b"]])          # (H+1,)

    slab = jnp.zeros((L["rows"], L["lanes"]), f32)
    slab = slab.at[L["w1"]:L["w1"] + H, :].set(w1_in)
    slab = slab.at[L["w1"] + H:L["w1"] + 2 * H, :].set(w1_hid)
    slab = slab.at[L["b1"], :].set(b1)
    slab = slab.at[L["b0"], :3 * H].set(b0)
    slab = slab.at[L["ghb0"], :3 * H].set(ghb0)
    slab = slab.at[L["head"], :H + 1].set(head)
    slab = slab.at[L["whh0"]:L["whh0"] + H, :3 * H].set(l0["w_hh"].T)
    slab = slab.at[L["wih0"]:L["wih0"] + D, :3 * H].set(l0["w_ih"].T)
    return slab


# ------------------------------ pure-JAX reference ----------------------------
def _forward_ref(features, labels, raw):
    """PyTorch-style GRU math on the raw (unpacked, unfolded) parameters."""
    B, T, D = features.shape
    H = raw["l0"]["w_hh"].shape[1]
    x = jnp.transpose(features, (1, 0, 2)).astype(jnp.float32)   # (T, B, D)

    def layer(x_tbd, p):
        h = jnp.zeros((B, H), jnp.float32)
        hs = []
        for t in range(T):
            gi = x_tbd[t] @ p["w_ih"].T + p["b_ih"]
            gh = h @ p["w_hh"].T + p["b_hh"]
            r = jax.nn.sigmoid(gi[:, :H] + gh[:, :H])
            z = jax.nn.sigmoid(gi[:, H:2 * H] + gh[:, H:2 * H])
            n = jnp.tanh(gi[:, 2 * H:] + r * gh[:, 2 * H:])
            h = (1.0 - z) * n + z * h
            hs.append(h)
        return jnp.stack(hs), h

    hseq0, _ = layer(x, raw["l0"])
    _, hfin1 = layer(hseq0, raw["l1"])
    result = hfin1 @ raw["out_w"].T + raw["out_b"]
    loss = jnp.mean((result - labels.astype(jnp.float32)) ** 2)
    return loss, result


if __name__ == "__main__":
    B, T, D, H = 2, 8, 4, 32

    key = jax.random.PRNGKey(0)
    k_feat, k_lab, k_par = jax.random.split(key, 3)
    features = jax.random.normal(k_feat, (B, T, D), jnp.float32)
    labels = jax.random.normal(k_lab, (B, 1), jnp.float32)
    raw_params, param_slab = init_params(k_par, D, H)

    loss, result, correct, valid = example_regression_forward(
        features, labels, param_slab)
    jax.block_until_ready((loss, result, correct, valid))

    # correctness check against a pure-JAX reference (PyTorch-layout math)
    loss_ref, result_ref = _forward_ref(features, labels, raw_params)
    assert jnp.allclose(result, result_ref, atol=1e-4, rtol=1e-4), "result mismatch"
    assert jnp.allclose(loss, loss_ref, atol=1e-4, rtol=1e-4), "loss mismatch"

    print("KERNEL_OK")
</pallas_src>

<mosaic_0001>
module attributes {stable_mosaic.version = 11 : i64} {
  func.func @kernel(%arg0: memref<2x8x4xf32, #tpu.memory_space<vmem>>, %arg1: memref<2x1xf32, #tpu.memory_space<vmem>>, %arg2: memref<112x128xf32, #tpu.memory_space<vmem>>, %arg3: memref<1x1xf32, #tpu.memory_space<vmem>>, %arg4: memref<2x1xf32, #tpu.memory_space<vmem>>) attributes {dimension_semantics = [], scalar_prefetch = 0 : i64, scratch_operands = 0 : i64, tpu.core_type = #tpu.core_type<tc>} {
    %c0 = arith.constant 0 : index
    %c0_0 = arith.constant 0 : index
    %0 = vector.load %arg2[%c0, %c0_0] : memref<112x128xf32, #tpu.memory_space<vmem>>, vector<32x128xf32>
    %c32 = arith.constant 32 : index
    %c0_1 = arith.constant 0 : index
    %1 = vector.load %arg2[%c32, %c0_1] : memref<112x128xf32, #tpu.memory_space<vmem>>, vector<32x128xf32>
    %c64 = arith.constant 64 : index
    %c0_2 = arith.constant 0 : index
    %2 = vector.load %arg2[%c64, %c0_2] : memref<112x128xf32, #tpu.memory_space<vmem>>, vector<1x128xf32>
    %c65 = arith.constant 65 : index
    %c0_3 = arith.constant 0 : index
    %3 = vector.load %arg2[%c65, %c0_3] : memref<112x128xf32, #tpu.memory_space<vmem>>, vector<1x96xf32>
    %c66 = arith.constant 66 : index
    %c0_4 = arith.constant 0 : index
    %4 = vector.load %arg2[%c66, %c0_4] : memref<112x128xf32, #tpu.memory_space<vmem>>, vector<1x96xf32>
    %c67 = arith.constant 67 : index
    %c0_5 = arith.constant 0 : index
    %5 = vector.load %arg2[%c67, %c0_5] : memref<112x128xf32, #tpu.memory_space<vmem>>, vector<1x32xf32>
    %c67_6 = arith.constant 67 : index
    %c32_7 = arith.constant 32 : index
    %6 = vector.load %arg2[%c67_6, %c32_7] : memref<112x128xf32, #tpu.memory_space<vmem>>, vector<1x1xf32>
    %c72 = arith.constant 72 : index
    %c0_8 = arith.constant 0 : index
    %7 = vector.load %arg2[%c72, %c0_8] : memref<112x128xf32, #tpu.memory_space<vmem>>, vector<32x96xf32>
    %c104 = arith.constant 104 : index
    %c0_9 = arith.constant 0 : index
    %8 = vector.load %arg2[%c104, %c0_9] : memref<112x128xf32, #tpu.memory_space<vmem>>, vector<4x96xf32>
    %c0_10 = arith.constant 0 : index
    %c0_11 = arith.constant 0 : index
    %c0_12 = arith.constant 0 : index
    %9 = vector.load %arg0[%c0_10, %c0_11, %c0_12] : memref<2x8x4xf32, #tpu.memory_space<vmem>>, vector<1x8x4xf32>
    %10 = vector.shape_cast %9 : vector<1x8x4xf32> to vector<8x4xf32>
    %cst = arith.constant dense<0.000000e+00> : vector<8x96xf32>
    %11 = tpu.matmul %10, %8, %cst {dimension_numbers = #tpu.dot_dimension_numbers<[1], [0], [0], [1], [0, 0, 1, 1], [], []>} : vector<8x4xf32>, vector<4x96xf32>, vector<8x96xf32> -> vector<8x96xf32>
    %12 = vector.broadcast %3 : vector<1x96xf32> to vector<8x96xf32>
    %13 = arith.addf %11, %12 : vector<8x96xf32>
    %c1 = arith.constant 1 : index
    %c0_13 = arith.constant 0 : index
    %c0_14 = arith.constant 0 : index
    %14 = vector.load %arg0[%c1, %c0_13, %c0_14] : memref<2x8x4xf32, #tpu.memory_space<vmem>>, vector<1x8x4xf32>
    %15 = vector.shape_cast %14 : vector<1x8x4xf32> to vector<8x4xf32>
    %cst_15 = arith.constant dense<0.000000e+00> : vector<8x96xf32>
    %16 = tpu.matmul %15, %8, %cst_15 {dimension_numbers = #tpu.dot_dimension_numbers<[1], [0], [0], [1], [0, 0, 1, 1], [], []>} : vector<8x4xf32>, vector<4x96xf32>, vector<8x96xf32> -> vector<8x96xf32>
    %17 = vector.broadcast %3 : vector<1x96xf32> to vector<8x96xf32>
    %18 = arith.addf %16, %17 : vector<8x96xf32>
    %cst_16 = arith.constant 0.000000e+00 : f32
    %19 = vector.broadcast %cst_16 : f32 to vector<2x32xf32>
    %cst_17 = arith.constant 0.000000e+00 : f32
    %20 = vector.broadcast %cst_17 : f32 to vector<2x32xf32>
    %21 = vector.extract_strided_slice %13 {offsets = [0, 0], sizes = [1, 96], strides = [1, 1]} : vector<8x96xf32> to vector<1x96xf32>
    %22 = vector.extract_strided_slice %18 {offsets = [0, 0], sizes = [1, 96], strides = [1, 1]} : vector<8x96xf32> to vector<1x96xf32>
    %23 = tpu.concatenate %21, %22 in 0 : vector<1x96xf32>, vector<1x96xf32> -> vector<2x96xf32>
    %24 = vector.extract_strided_slice %23 {offsets = [0, 0], sizes = [2, 64], strides = [1, 1]} : vector<2x96xf32> to vector<2x64xf32>
    %25 = vector.extract_strided_slice %4 {offsets = [0, 0], sizes = [1, 64], strides = [1, 1]} : vector<1x96xf32> to vector<1x64xf32>
    %26 = vector.broadcast %25 : vector<1x64xf32> to vector<2x64xf32>
    %27 = arith.addf %24, %26 : vector<2x64xf32>
    %28 = arith.negf %27 : vector<2x64xf32>
    %29 = math.exp %28 : vector<2x64xf32>
    %cst_18 = arith.constant 1.000000e+00 : f32
    %30 = vector.broadcast %cst_18 : f32 to vector<2x64xf32>
    %31 = arith.addf %30, %29 : vector<2x64xf32>
    %32 = arith.divf %30, %31 : vector<2x64xf32>
    %33 = vector.extract_strided_slice %23 {offsets = [0, 64], sizes = [2, 32], strides = [1, 1]} : vector<2x96xf32> to vector<2x32xf32>
    %34 = vector.extract_strided_slice %32 {offsets = [0, 0], sizes = [2, 32], strides = [1, 1]} : vector<2x64xf32> to vector<2x32xf32>
    %35 = vector.extract_strided_slice %4 {offsets = [0, 64], sizes = [1, 32], strides = [1, 1]} : vector<1x96xf32> to vector<1x32xf32>
    %36 = vector.broadcast %35 : vector<1x32xf32> to vector<2x32xf32>
    %37 = arith.mulf %34, %36 : vector<2x32xf32>
    %38 = arith.addf %33, %37 : vector<2x32xf32>
    %39 = math.tanh %38 : vector<2x32xf32>
    %40 = vector.extract_strided_slice %32 {offsets = [0, 32], sizes = [2, 32], strides = [1, 1]} : vector<2x64xf32> to vector<2x32xf32>
    %41 = arith.subf %19, %39 : vector<2x32xf32>
    %42 = arith.mulf %40, %41 : vector<2x32xf32>
    %43 = arith.addf %39, %42 : vector<2x32xf32>
    %cst_19 = arith.constant dense<0.000000e+00> : vector<2x128xf32>
    %44 = tpu.matmul %43, %0, %cst_19 {dimension_numbers = #tpu.dot_dimension_numbers<[1], [0], [0], [1], [0, 0, 1, 1], [], []>} : vector<2x32xf32>, vector<32x128xf32>, vector<2x128xf32> -> vector<2x128xf32>
    %45 = vector.broadcast %2 : vector<1x128xf32> to vector<2x128xf32>
    %46 = arith.addf %44, %45 : vector<2x128xf32>
    %47 = vector.extract_strided_slice %46 {offsets = [0, 0], sizes = [2, 64], strides = [1, 1]} : vector<2x128xf32> to vector<2x64xf32>
    %48 = arith.negf %47 : vector<2x64xf32>
    %49 = math.exp %48 : vector<2x64xf32>
    %cst_20 = arith.constant 1.000000e+00 : f32
    %50 = vector.broadcast %cst_20 : f32 to vector<2x64xf32>
    %51 = arith.addf %50, %49 : vector<2x64xf32>
    %52 = arith.divf %50, %51 : vector<2x64xf32>
    %53 = vector.extract_strided_slice %46 {offsets = [0, 64], sizes = [2, 32], strides = [1, 1]} : vector<2x128xf32> to vector<2x32xf32>
    %54 = vector.extract_strided_slice %52 {offsets = [0, 0], sizes = [2, 32], strides = [1, 1]} : vector<2x64xf32> to vector<2x32xf32>
    %55 = vector.extract_strided_slice %46 {offsets = [0, 96], sizes = [2, 32], strides = [1, 1]} : vector<2x128xf32> to vector<2x32xf32>
    %56 = arith.mulf %54, %55 : vector<2x32xf32>
    %57 = arith.addf %53, %56 : vector<2x32xf32>
    %58 = math.tanh %57 : vector<2x32xf32>
    %59 = vector.extract_strided_slice %52 {offsets = [0, 32], sizes = [2, 32], strides = [1, 1]} : vector<2x64xf32> to vector<2x32xf32>
    %60 = arith.subf %20, %58 : vector<2x32xf32>
    %61 = arith.mulf %59, %60 : vector<2x32xf32>
    %62 = arith.addf %58, %61 : vector<2x32xf32>
    %63 = vector.extract_strided_slice %13 {offsets = [1, 0], sizes = [1, 96], strides = [1, 1]} : vector<8x96xf32> to vector<1x96xf32>
    %64 = vector.extract_strided_slice %18 {offsets = [1, 0], sizes = [1, 96], strides = [1, 1]} : vector<8x96xf32> to vector<1x96xf32>
    %65 = tpu.concatenate %63, %64 in 0 : vector<1x96xf32>, vector<1x96xf32> -> vector<2x96xf32>
    %cst_21 = arith.constant dense<0.000000e+00> : vector<2x96xf32>
    %66 = tpu.matmul %43, %7, %cst_21 {dimension_numbers = #tpu.dot_dimension_numbers<[1], [0], [0], [1], [0, 0, 1, 1], [], []>} : vector<2x32xf32>, vector<32x96xf32>, vector<2x96xf32> -> vector<2x96xf32>
    %67 = vector.broadcast %4 : vector<1x96xf32> to vector<2x96xf32>
    %68 = arith.addf %66, %67 : vector<2x96xf32>
    %69 = vector.extract_strided_slice %65 {offsets = [0, 0], sizes = [2, 64], strides = [1, 1]} : vector<2x96xf32> to vector<2x64xf32>
    %70 = vector.extract_strided_slice %68 {offsets = [0, 0], sizes = [2, 64], strides = [1, 1]} : vector<2x96xf32> to vector<2x64xf32>
    %71 = arith.addf %69, %70 : vector<2x64xf32>
    %72 = arith.negf %71 : vector<2x64xf32>
    %73 = math.exp %72 : vector<2x64xf32>
    %cst_22 = arith.constant 1.000000e+00 : f32
    %74 = vector.broadcast %cst_22 : f32 to vector<2x64xf32>
    %75 = arith.addf %74, %73 : vector<2x64xf32>
    %76 = arith.divf %74, %75 : vector<2x64xf32>
    %77 = vector.extract_strided_slice %65 {offsets = [0, 64], sizes = [2, 32], strides = [1, 1]} : vector<2x96xf32> to vector<2x32xf32>
    %78 = vector.extract_strided_slice %76 {offsets = [0, 0], sizes = [2, 32], strides = [1, 1]} : vector<2x64xf32> to vector<2x32xf32>
    %79 = vector.extract_strided_slice %68 {offsets = [0, 64], sizes = [2, 32], strides = [1, 1]} : vector<2x96xf32> to vector<2x32xf32>
    %80 = arith.mulf %78, %79 : vector<2x32xf32>
    %81 = arith.addf %77, %80 : vector<2x32xf32>
    %82 = math.tanh %81 : vector<2x32xf32>
    %83 = vector.extract_strided_slice %76 {offsets = [0, 32], sizes = [2, 32], strides = [1, 1]} : vector<2x64xf32> to vector<2x32xf32>
    %84 = arith.subf %43, %82 : vector<2x32xf32>
    %85 = arith.mulf %83, %84 : vector<2x32xf32>
    %86 = arith.addf %82, %85 : vector<2x32xf32>
    %cst_23 = arith.constant dense<0.000000e+00> : vector<2x128xf32>
    %87 = tpu.matmul %86, %0, %cst_23 {dimension_numbers = #tpu.dot_dimension_numbers<[1], [0], [0], [1], [0, 0, 1, 1], [], []>} : vector<2x32xf32>, vector<32x128xf32>, vector<2x128xf32> -> vector<2x128xf32>
    %cst_24 = arith.constant dense<0.000000e+00> : vector<2x128xf32>
    %88 = tpu.matmul %62, %1, %cst_24 {dimension_numbers = #tpu.dot_dimension_numbers<[1], [0], [0], [1], [0, 0, 1, 1], [], []>} : vector<2x32xf32>, vector<32x128xf32>, vector<2x128xf32> -> vector<2x128xf32>
    %89 = arith.addf %87, %88 : vector<2x128xf32>
    %90 = vector.broadcast %2 : vector<1x128xf32> to vector<2x128xf32>
    %91 = arith.addf %89, %90 : vector<2x128xf32>
    %92 = vector.extract_strided_slice %91 {offsets = [0, 0], sizes = [2, 64], strides = [1, 1]} : vector<2x128xf32> to vector<2x64xf32>
    %93 = arith.negf %92 : vector<2x64xf32>
    %94 = math.exp %93 : vector<2x64xf32>
    %cst_25 = arith.constant 1.000000e+00 : f32
    %95 = vector.broadcast %cst_25 : f32 to vector<2x64xf32>
    %96 = arith.addf %95, %94 : vector<2x64xf32>
    %97 = arith.divf %95, %96 : vector<2x64xf32>
    %98 = vector.extract_strided_slice %91 {offsets = [0, 64], sizes = [2, 32], strides = [1, 1]} : vector<2x128xf32> to vector<2x32xf32>
    %99 = vector.extract_strided_slice %97 {offsets = [0, 0], sizes = [2, 32], strides = [1, 1]} : vector<2x64xf32> to vector<2x32xf32>
    %100 = vector.extract_strided_slice %91 {offsets = [0, 96], sizes = [2, 32], strides = [1, 1]} : vector<2x128xf32> to vector<2x32xf32>
    %101 = arith.mulf %99, %100 : vector<2x32xf32>
    %102 = arith.addf %98, %101 : vector<2x32xf32>
    %103 = math.tanh %102 : vector<2x32xf32>
    %104 = vector.extract_strided_slice %97 {offsets = [0, 32], sizes = [2, 32], strides = [1, 1]} : vector<2x64xf32> to vector<2x32xf32>
    %105 = arith.subf %62, %103 : vector<2x32xf32>
    %106 = arith.mulf %104, %105 : vector<2x32xf32>
    %107 = arith.addf %103, %106 : vector<2x32xf32>
    %108 = vector.extract_strided_slice %13 {offsets = [2, 0], sizes = [1, 96], strides = [1, 1]} : vector<8x96xf32> to vector<1x96xf32>
    %109 = vector.extract_strided_slice %18 {offsets = [2, 0], sizes = [1, 96], strides = [1, 1]} : vector<8x96xf32> to vector<1x96xf32>
    %110 = tpu.concatenate %108, %109 in 0 : vector<1x96xf32>, vector<1x96xf32> -> vector<2x96xf32>
    %cst_26 = arith.constant dense<0.000000e+00> : vector<2x96xf32>
    %111 = tpu.matmul %86, %7, %cst_26 {dimension_numbers = #tpu.dot_dimension_numbers<[1], [0], [0], [1], [0, 0, 1, 1], [], []>} : vector<2x32xf32>, vector<32x96xf32>, vector<2x96xf32> -> vector<2x96xf32>
    %112 = vector.broadcast %4 : vector<1x96xf32> to vector<2x96xf32>
    %113 = arith.addf %111, %112 : vector<2x96xf32>
    %114 = vector.extract_strided_slice %110 {offsets = [0, 0], sizes = [2, 64], strides = [1, 1]} : vector<2x96xf32> to vector<2x64xf32>
    %115 = vector.extract_strided_slice %113 {offsets = [0, 0], sizes = [2, 64], strides = [1, 1]} : vector<2x96xf32> to vector<2x64xf32>
    %116 = arith.addf %114, %115 : vector<2x64xf32>
    %117 = arith.negf %116 : vector<2x64xf32>
    %118 = math.exp %117 : vector<2x64xf32>
    %cst_27 = arith.constant 1.000000e+00 : f32
    %119 = vector.broadcast %cst_27 : f32 to vector<2x64xf32>
    %120 = arith.addf %119, %118 : vector<2x64xf32>
    %121 = arith.divf %119, %120 : vector<2x64xf32>
    %122 = vector.extract_strided_slice %110 {offsets = [0, 64], sizes = [2, 32], strides = [1, 1]} : vector<2x96xf32> to vector<2x32xf32>
    %123 = vector.extract_strided_slice %121 {offsets = [0, 0], sizes = [2, 32], strides = [1, 1]} : vector<2x64xf32> to vector<2x32xf32>
    %124 = vector.extract_strided_slice %113 {offsets = [0, 64], sizes = [2, 32], strides = [1, 1]} : vector<2x96xf32> to vector<2x32xf32>
    %125 = arith.mulf %123, %124 : vector<2x32xf32>
    %126 = arith.addf %122, %125 : vector<2x32xf32>
    %127 = math.tanh %126 : vector<2x32xf32>
    %128 = vector.extract_strided_slice %121 {offsets = [0, 32], sizes = [2, 32], strides = [1, 1]} : vector<2x64xf32> to vector<2x32xf32>
    %129 = arith.subf %86, %127 : vector<2x32xf32>
    %130 = arith.mulf %128, %129 : vector<2x32xf32>
    %131 = arith.addf %127, %130 : vector<2x32xf32>
    %cst_28 = arith.constant dense<0.000000e+00> : vector<2x128xf32>
    %132 = tpu.matmul %131, %0, %cst_28 {dimension_numbers = #tpu.dot_dimension_numbers<[1], [0], [0], [1], [0, 0, 1, 1], [], []>} : vector<2x32xf32>, vector<32x128xf32>, vector<2x128xf32> -> vector<2x128xf32>
    %cst_29 = arith.constant dense<0.000000e+00> : vector<2x128xf32>
    %133 = tpu.matmul %107, %1, %cst_29 {dimension_numbers = #tpu.dot_dimension_numbers<[1], [0], [0], [1], [0, 0, 1, 1], [], []>} : vector<2x32xf32>, vector<32x128xf32>, vector<2x128xf32> -> vector<2x128xf32>
    %134 = arith.addf %132, %133 : vector<2x128xf32>
    %135 = vector.broadcast %2 : vector<1x128xf32> to vector<2x128xf32>
    %136 = arith.addf %134, %135 : vector<2x128xf32>
    %137 = vector.extract_strided_slice %136 {offsets = [0, 0], sizes = [2, 64], strides = [1, 1]} : vector<2x128xf32> to vector<2x64xf32>
    %138 = arith.negf %137 : vector<2x64xf32>
    %139 = math.exp %138 : vector<2x64xf32>
    %cst_30 = arith.constant 1.000000e+00 : f32
    %140 = vector.broadcast %cst_30 : f32 to vector<2x64xf32>
    %141 = arith.addf %140, %139 : vector<2x64xf32>
    %142 = arith.divf %140, %141 : vector<2x64xf32>
    %143 = vector.extract_strided_slice %136 {offsets = [0, 64], sizes = [2, 32], strides = [1, 1]} : vector<2x128xf32> to vector<2x32xf32>
    %144 = vector.extract_strided_slice %142 {offsets = [0, 0], sizes = [2, 32], strides = [1, 1]} : vector<2x64xf32> to vector<2x32xf32>
    %145 = vector.extract_strided_slice %136 {offsets = [0, 96], sizes = [2, 32], strides = [1, 1]} : vector<2x128xf32> to vector<2x32xf32>
    %146 = arith.mulf %144, %145 : vector<2x32xf32>
    %147 = arith.addf %143, %146 : vector<2x32xf32>
    %148 = math.tanh %147 : vector<2x32xf32>
    %149 = vector.extract_strided_slice %142 {offsets = [0, 32], sizes = [2, 32], strides = [1, 1]} : vector<2x64xf32> to vector<2x32xf32>
    %150 = arith.subf %107, %148 : vector<2x32xf32>
    %151 = arith.mulf %149, %150 : vector<2x32xf32>
    %152 = arith.addf %148, %151 : vector<2x32xf32>
    %153 = vector.extract_strided_slice %13 {offsets = [3, 0], sizes = [1, 96], strides = [1, 1]} : vector<8x96xf32> to vector<1x96xf32>
    %154 = vector.extract_strided_slice %18 {offsets = [3, 0], sizes = [1, 96], strides = [1, 1]} : vector<8x96xf32> to vector<1x96xf32>
    %155 = tpu.concatenate %153, %154 in 0 : vector<1x96xf32>, vector<1x96xf32> -> vector<2x96xf32>
    %cst_31 = arith.constant dense<0.000000e+00> : vector<2x96xf32>
    %156 = tpu.matmul %131, %7, %cst_31 {dimension_numbers = #tpu.dot_dimension_numbers<[1], [0], [0], [1], [0, 0, 1, 1], [], []>} : vector<2x32xf32>, vector<32x96xf32>, vector<2x96xf32> -> vector<2x96xf32>
    %157 = vector.broadcast %4 : vector<1x96xf32> to vector<2x96xf32>
    %158 = arith.addf %156, %157 : vector<2x96xf32>
    %159 = vector.extract_strided_slice %155 {offsets = [0, 0], sizes = [2, 64], strides = [1, 1]} : vector<2x96xf32> to vector<2x64xf32>
    %160 = vector.extract_strided_slice %158 {offsets = [0, 0], sizes = [2, 64], strides = [1, 1]} : vector<2x96xf32> to vector<2x64xf32>
    %161 = arith.addf %159, %160 : vector<2x64xf32>
    %162 = arith.negf %161 : vector<2x64xf32>
    %163 = math.exp %162 : vector<2x64xf32>
    %cst_32 = arith.constant 1.000000e+00 : f32
    %164 = vector.broadcast %cst_32 : f32 to vector<2x64xf32>
    %165 = arith.addf %164, %163 : vector<2x64xf32>
    %166 = arith.divf %164, %165 : vector<2x64xf32>
    %167 = vector.extract_strided_slice %155 {offsets = [0, 64], sizes = [2, 32], strides = [1, 1]} : vector<2x96xf32> to vector<2x32xf32>
    %168 = vector.extract_strided_slice %166 {offsets = [0, 0], sizes = [2, 32], strides = [1, 1]} : vector<2x64xf32> to vector<2x32xf32>
    %169 = vector.extract_strided_slice %158 {offsets = [0, 64], sizes = [2, 32], strides = [1, 1]} : vector<2x96xf32> to vector<2x32xf32>
    %170 = arith.mulf %168, %169 : vector<2x32xf32>
    %171 = arith.addf %167, %170 : vector<2x32xf32>
    %172 = math.tanh %171 : vector<2x32xf32>
    %173 = vector.extract_strided_slice %166 {offsets = [0, 32], sizes = [2, 32], strides = [1, 1]} : vector<2x64xf32> to vector<2x32xf32>
    %174 = arith.subf %131, %172 : vector<2x32xf32>
    %175 = arith.mulf %173, %174 : vector<2x32xf32>
    %176 = arith.addf %172, %175 : vector<2x32xf32>
    %cst_33 = arith.constant dense<0.000000e+00> : vector<2x128xf32>
    %177 = tpu.matmul %176, %0, %cst_33 {dimension_numbers = #tpu.dot_dimension_numbers<[1], [0], [0], [1], [0, 0, 1, 1], [], []>} : vector<2x32xf32>, vector<32x128xf32>, vector<2x128xf32> -> vector<2x128xf32>
    %cst_34 = arith.constant dense<0.000000e+00> : vector<2x128xf32>
    %178 = tpu.matmul %152, %1, %cst_34 {dimension_numbers = #tpu.dot_dimension_numbers<[1], [0], [0], [1], [0, 0, 1, 1], [], []>} : vector<2x32xf32>, vector<32x128xf32>, vector<2x128xf32> -> vector<2x128xf32>
    %179 = arith.addf %177, %178 : vector<2x128xf32>
    %180 = vector.broadcast %2 : vector<1x128xf32> to vector<2x128xf32>
    %181 = arith.addf %179, %180 : vector<2x128xf32>
    %182 = vector.extract_strided_slice %181 {offsets = [0, 0], sizes = [2, 64], strides = [1, 1]} : vector<2x128xf32> to vector<2x64xf32>
    %183 = arith.negf %182 : vector<2x64xf32>
    %184 = math.exp %183 : vector<2x64xf32>
    %cst_35 = arith.constant 1.000000e+00 : f32
    %185 = vector.broadcast %cst_35 : f32 to vector<2x64xf32>
    %186 = arith.addf %185, %184 : vector<2x64xf32>
    %187 = arith.divf %185, %186 : vector<2x64xf32>
    %188 = vector.extract_strided_slice %181 {offsets = [0, 64], sizes = [2, 32], strides = [1, 1]} : vector<2x128xf32> to vector<2x32xf32>
    %189 = vector.extract_strided_slice %187 {offsets = [0, 0], sizes = [2, 32], strides = [1, 1]} : vector<2x64xf32> to vector<2x32xf32>
    %190 = vector.extract_strided_slice %181 {offsets = [0, 96], sizes = [2, 32], strides = [1, 1]} : vector<2x128xf32> to vector<2x32xf32>
    %191 = arith.mulf %189, %190 : vector<2x32xf32>
    %192 = arith.addf %188, %191 : vector<2x32xf32>
    %193 = math.tanh %192 : vector<2x32xf32>
    %194 = vector.extract_strided_slice %187 {offsets = [0, 32], sizes = [2, 32], strides = [1, 1]} : vector<2x64xf32> to vector<2x32xf32>
    %195 = arith.subf %152, %193 : vector<2x32xf32>
    %196 = arith.mulf %194, %195 : vector<2x32xf32>
    %197 = arith.addf %193, %196 : vector<2x32xf32>
    %198 = vector.extract_strided_slice %13 {offsets = [4, 0], sizes = [1, 96], strides = [1, 1]} : vector<8x96xf32> to vector<1x96xf32>
    %199 = vector.extract_strided_slice %18 {offsets = [4, 0], sizes = [1, 96], strides = [1, 1]} : vector<8x96xf32> to vector<1x96xf32>
    %200 = tpu.concatenate %198, %199 in 0 : vector<1x96xf32>, vector<1x96xf32> -> vector<2x96xf32>
    %cst_36 = arith.constant dense<0.000000e+00> : vector<2x96xf32>
    %201 = tpu.matmul %176, %7, %cst_36 {dimension_numbers = #tpu.dot_dimension_numbers<[1], [0], [0], [1], [0, 0, 1, 1], [], []>} : vector<2x32xf32>, vector<32x96xf32>, vector<2x96xf32> -> vector<2x96xf32>
    %202 = vector.broadcast %4 : vector<1x96xf32> to vector<2x96xf32>
    %203 = arith.addf %201, %202 : vector<2x96xf32>
    %204 = vector.extract_strided_slice %200 {offsets = [0, 0], sizes = [2, 64], strides = [1, 1]} : vector<2x96xf32> to vector<2x64xf32>
    %205 = vector.extract_strided_slice %203 {offsets = [0, 0], sizes = [2, 64], strides = [1, 1]} : vector<2x96xf32> to vector<2x64xf32>
    %206 = arith.addf %204, %205 : vector<2x64xf32>
    %207 = arith.negf %206 : vector<2x64xf32>
    %208 = math.exp %207 : vector<2x64xf32>
    %cst_37 = arith.constant 1.000000e+00 : f32
    %209 = vector.broadcast %cst_37 : f32 to vector<2x64xf32>
    %210 = arith.addf %209, %208 : vector<2x64xf32>
    %211 = arith.divf %209, %210 : vector<2x64xf32>
    %212 = vector.extract_strided_slice %200 {offsets = [0, 64], sizes = [2, 32], strides = [1, 1]} : vector<2x96xf32> to vector<2x32xf32>
    %213 = vector.extract_strided_slice %211 {offsets = [0, 0], sizes = [2, 32], strides = [1, 1]} : vector<2x64xf32> to vector<2x32xf32>
    %214 = vector.extract_strided_slice %203 {offsets = [0, 64], sizes = [2, 32], strides = [1, 1]} : vector<2x96xf32> to vector<2x32xf32>
    %215 = arith.mulf %213, %214 : vector<2x32xf32>
    %216 = arith.addf %212, %215 : vector<2x32xf32>
    %217 = math.tanh %216 : vector<2x32xf32>
    %218 = vector.extract_strided_slice %211 {offsets = [0, 32], sizes = [2, 32], strides = [1, 1]} : vector<2x64xf32> to vector<2x32xf32>
    %219 = arith.subf %176, %217 : vector<2x32xf32>
    %220 = arith.mulf %218, %219 : vector<2x32xf32>
    %221 = arith.addf %217, %220 : vector<2x32xf32>
    %cst_38 = arith.constant dense<0.000000e+00> : vector<2x128xf32>
    %222 = tpu.matmul %221, %0, %cst_38 {dimension_numbers = #tpu.dot_dimension_numbers<[1], [0], [0], [1], [0, 0, 1, 1], [], []>} : vector<2x32xf32>, vector<32x128xf32>, vector<2x128xf32> -> vector<2x128xf32>
    %cst_39 = arith.constant dense<0.000000e+00> : vector<2x128xf32>
    %223 = tpu.matmul %197, %1, %cst_39 {dimension_numbers = #tpu.dot_dimension_numbers<[1], [0], [0], [1], [0, 0, 1, 1], [], []>} : vector<2x32xf32>, vector<32x128xf32>, vector<2x128xf32> -> vector<2x128xf32>
    %224 = arith.addf %222, %223 : vector<2x128xf32>
    %225 = vector.broadcast %2 : vector<1x128xf32> to vector<2x128xf32>
    %226 = arith.addf %224, %225 : vector<2x128xf32>
    %227 = vector.extract_strided_slice %226 {offsets = [0, 0], sizes = [2, 64], strides = [1, 1]} : vector<2x128xf32> to vector<2x64xf32>
    %228 = arith.negf %227 : vector<2x64xf32>
    %229 = math.exp %228 : vector<2x64xf32>
    %cst_40 = arith.constant 1.000000e+00 : f32
    %230 = vector.broadcast %cst_40 : f32 to vector<2x64xf32>
    %231 = arith.addf %230, %229 : vector<2x64xf32>
    %232 = arith.divf %230, %231 : vector<2x64xf32>
    %233 = vector.extract_strided_slice %226 {offsets = [0, 64], sizes = [2, 32], strides = [1, 1]} : vector<2x128xf32> to vector<2x32xf32>
    %234 = vector.extract_strided_slice %232 {offsets = [0, 0], sizes = [2, 32], strides = [1, 1]} : vector<2x64xf32> to vector<2x32xf32>
    %235 = vector.extract_strided_slice %226 {offsets = [0, 96], sizes = [2, 32], strides = [1, 1]} : vector<2x128xf32> to vector<2x32xf32>
    %236 = arith.mulf %234, %235 : vector<2x32xf32>
    %237 = arith.addf %233, %236 : vector<2x32xf32>
    %238 = math.tanh %237 : vector<2x32xf32>
    %239 = vector.extract_strided_slice %232 {offsets = [0, 32], sizes = [2, 32], strides = [1, 1]} : vector<2x64xf32> to vector<2x32xf32>
    %240 = arith.subf %197, %238 : vector<2x32xf32>
    %241 = arith.mulf %239, %240 : vector<2x32xf32>
    %242 = arith.addf %238, %241 : vector<2x32xf32>
    %243 = vector.extract_strided_slice %13 {offsets = [5, 0], sizes = [1, 96], strides = [1, 1]} : vector<8x96xf32> to vector<1x96xf32>
    %244 = vector.extract_strided_slice %18 {offsets = [5, 0], sizes = [1, 96], strides = [1, 1]} : vector<8x96xf32> to vector<1x96xf32>
    %245 = tpu.concatenate %243, %244 in 0 : vector<1x96xf32>, vector<1x96xf32> -> vector<2x96xf32>
    %cst_41 = arith.constant dense<0.000000e+00> : vector<2x96xf32>
    %246 = tpu.matmul %221, %7, %cst_41 {dimension_numbers = #tpu.dot_dimension_numbers<[1], [0], [0], [1], [0, 0, 1, 1], [], []>} : vector<2x32xf32>, vector<32x96xf32>, vector<2x96xf32> -> vector<2x96xf32>
    %247 = vector.broadcast %4 : vector<1x96xf32> to vector<2x96xf32>
    %248 = arith.addf %246, %247 : vector<2x96xf32>
    %249 = vector.extract_strided_slice %245 {offsets = [0, 0], sizes = [2, 64], strides = [1, 1]} : vector<2x96xf32> to vector<2x64xf32>
    %250 = vector.extract_strided_slice %248 {offsets = [0, 0], sizes = [2, 64], strides = [1, 1]} : vector<2x96xf32> to vector<2x64xf32>
    %251 = arith.addf %249, %250 : vector<2x64xf32>
    %252 = arith.negf %251 : vector<2x64xf32>
    %253 = math.exp %252 : vector<2x64xf32>
    %cst_42 = arith.constant 1.000000e+00 : f32
    %254 = vector.broadcast %cst_42 : f32 to vector<2x64xf32>
    %255 = arith.addf %254, %253 : vector<2x64xf32>
    %256 = arith.divf %254, %255 : vector<2x64xf32>
    %257 = vector.extract_strided_slice %245 {offsets = [0, 64], sizes = [2, 32], strides = [1, 1]} : vector<2x96xf32> to vector<2x32xf32>
    %258 = vector.extract_strided_slice %256 {offsets = [0, 0], sizes = [2, 32], strides = [1, 1]} : vector<2x64xf32> to vector<2x32xf32>
    %259 = vector.extract_strided_slice %248 {offsets = [0, 64], sizes = [2, 32], strides = [1, 1]} : vector<2x96xf32> to vector<2x32xf32>
    %260 = arith.mulf %258, %259 : vector<2x32xf32>
    %261 = arith.addf %257, %260 : vector<2x32xf32>
    %262 = math.tanh %261 : vector<2x32xf32>
    %263 = vector.extract_strided_slice %256 {offsets = [0, 32], sizes = [2, 32], strides = [1, 1]} : vector<2x64xf32> to vector<2x32xf32>
    %264 = arith.subf %221, %262 : vector<2x32xf32>
    %265 = arith.mulf %263, %264 : vector<2x32xf32>
    %266 = arith.addf %262, %265 : vector<2x32xf32>
    %cst_43 = arith.constant dense<0.000000e+00> : vector<2x128xf32>
    %267 = tpu.matmul %266, %0, %cst_43 {dimension_numbers = #tpu.dot_dimension_numbers<[1], [0], [0], [1], [0, 0, 1, 1], [], []>} : vector<2x32xf32>, vector<32x128xf32>, vector<2x128xf32> -> vector<2x128xf32>
    %cst_44 = arith.constant dense<0.000000e+00> : vector<2x128xf32>
    %268 = tpu.matmul %242, %1, %cst_44 {dimension_numbers = #tpu.dot_dimension_numbers<[1], [0], [0], [1], [0, 0, 1, 1], [], []>} : vector<2x32xf32>, vector<32x128xf32>, vector<2x128xf32> -> vector<2x128xf32>
    %269 = arith.addf %267, %268 : vector<2x128xf32>
    %270 = vector.broadcast %2 : vector<1x128xf32> to vector<2x128xf32>
    %271 = arith.addf %269, %270 : vector<2x128xf32>
    %272 = vector.extract_strided_slice %271 {offsets = [0, 0], sizes = [2, 64], strides = [1, 1]} : vector<2x128xf32> to vector<2x64xf32>
    %273 = arith.negf %272 : vector<2x64xf32>
    %274 = math.exp %273 : vector<2x64xf32>
    %cst_45 = arith.constant 1.000000e+00 : f32
    %275 = vector.broadcast %cst_45 : f32 to vector<2x64xf32>
    %276 = arith.addf %275, %274 : vector<2x64xf32>
    %277 = arith.divf %275, %276 : vector<2x64xf32>
    %278 = vector.extract_strided_slice %271 {offsets = [0, 64], sizes = [2, 32], strides = [1, 1]} : vector<2x128xf32> to vector<2x32xf32>
    %279 = vector.extract_strided_slice %277 {offsets = [0, 0], sizes = [2, 32], strides = [1, 1]} : vector<2x64xf32> to vector<2x32xf32>
    %280 = vector.extract_strided_slice %271 {offsets = [0, 96], sizes = [2, 32], strides = [1, 1]} : vector<2x128xf32> to vector<2x32xf32>
    %281 = arith.mulf %279, %280 : vector<2x32xf32>
    %282 = arith.addf %278, %281 : vector<2x32xf32>
    %283 = math.tanh %282 : vector<2x32xf32>
    %284 = vector.extract_strided_slice %277 {offsets = [0, 32], sizes = [2, 32], strides = [1, 1]} : vector<2x64xf32> to vector<2x32xf32>
    %285 = arith.subf %242, %283 : vector<2x32xf32>
    %286 = arith.mulf %284, %285 : vector<2x32xf32>
    %287 = arith.addf %283, %286 : vector<2x32xf32>
    %288 = vector.extract_strided_slice %13 {offsets = [6, 0], sizes = [1, 96], strides = [1, 1]} : vector<8x96xf32> to vector<1x96xf32>
    %289 = vector.extract_strided_slice %18 {offsets = [6, 0], sizes = [1, 96], strides = [1, 1]} : vector<8x96xf32> to vector<1x96xf32>
    %290 = tpu.concatenate %288, %289 in 0 : vector<1x96xf32>, vector<1x96xf32> -> vector<2x96xf32>
    %cst_46 = arith.constant dense<0.000000e+00> : vector<2x96xf32>
    %291 = tpu.matmul %266, %7, %cst_46 {dimension_numbers = #tpu.dot_dimension_numbers<[1], [0], [0], [1], [0, 0, 1, 1], [], []>} : vector<2x32xf32>, vector<32x96xf32>, vector<2x96xf32> -> vector<2x96xf32>
    %292 = vector.broadcast %4 : vector<1x96xf32> to vector<2x96xf32>
    %293 = arith.addf %291, %292 : vector<2x96xf32>
    %294 = vector.extract_strided_slice %290 {offsets = [0, 0], sizes = [2, 64], strides = [1, 1]} : vector<2x96xf32> to vector<2x64xf32>
    %295 = vector.extract_strided_slice %293 {offsets = [0, 0], sizes = [2, 64], strides = [1, 1]} : vector<2x96xf32> to vector<2x64xf32>
    %296 = arith.addf %294, %295 : vector<2x64xf32>
    %297 = arith.negf %296 : vector<2x64xf32>
    %298 = math.exp %297 : vector<2x64xf32>
    %cst_47 = arith.constant 1.000000e+00 : f32
    %299 = vector.broadcast %cst_47 : f32 to vector<2x64xf32>
    %300 = arith.addf %299, %298 : vector<2x64xf32>
    %301 = arith.divf %299, %300 : vector<2x64xf32>
    %302 = vector.extract_strided_slice %290 {offsets = [0, 64], sizes = [2, 32], strides = [1, 1]} : vector<2x96xf32> to vector<2x32xf32>
    %303 = vector.extract_strided_slice %301 {offsets = [0, 0], sizes = [2, 32], strides = [1, 1]} : vector<2x64xf32> to vector<2x32xf32>
    %304 = vector.extract_strided_slice %293 {offsets = [0, 64], sizes = [2, 32], strides = [1, 1]} : vector<2x96xf32> to vector<2x32xf32>
    %305 = arith.mulf %303, %304 : vector<2x32xf32>
    %306 = arith.addf %302, %305 : vector<2x32xf32>
    %307 = math.tanh %306 : vector<2x32xf32>
    %308 = vector.extract_strided_slice %301 {offsets = [0, 32], sizes = [2, 32], strides = [1, 1]} : vector<2x64xf32> to vector<2x32xf32>
    %309 = arith.subf %266, %307 : vector<2x32xf32>
    %310 = arith.mulf %308, %309 : vector<2x32xf32>
    %311 = arith.addf %307, %310 : vector<2x32xf32>
    %cst_48 = arith.constant dense<0.000000e+00> : vector<2x128xf32>
    %312 = tpu.matmul %311, %0, %cst_48 {dimension_numbers = #tpu.dot_dimension_numbers<[1], [0], [0], [1], [0, 0, 1, 1], [], []>} : vector<2x32xf32>, vector<32x128xf32>, vector<2x128xf32> -> vector<2x128xf32>
    %cst_49 = arith.constant dense<0.000000e+00> : vector<2x128xf32>
    %313 = tpu.matmul %287, %1, %cst_49 {dimension_numbers = #tpu.dot_dimension_numbers<[1], [0], [0], [1], [0, 0, 1, 1], [], []>} : vector<2x32xf32>, vector<32x128xf32>, vector<2x128xf32> -> vector<2x128xf32>
    %314 = arith.addf %312, %313 : vector<2x128xf32>
    %315 = vector.broadcast %2 : vector<1x128xf32> to vector<2x128xf32>
    %316 = arith.addf %314, %315 : vector<2x128xf32>
    %317 = vector.extract_strided_slice %316 {offsets = [0, 0], sizes = [2, 64], strides = [1, 1]} : vector<2x128xf32> to vector<2x64xf32>
    %318 = arith.negf %317 : vector<2x64xf32>
    %319 = math.exp %318 : vector<2x64xf32>
    %cst_50 = arith.constant 1.000000e+00 : f32
    %320 = vector.broadcast %cst_50 : f32 to vector<2x64xf32>
    %321 = arith.addf %320, %319 : vector<2x64xf32>
    %322 = arith.divf %320, %321 : vector<2x64xf32>
    %323 = vector.extract_strided_slice %316 {offsets = [0, 64], sizes = [2, 32], strides = [1, 1]} : vector<2x128xf32> to vector<2x32xf32>
    %324 = vector.extract_strided_slice %322 {offsets = [0, 0], sizes = [2, 32], strides = [1, 1]} : vector<2x64xf32> to vector<2x32xf32>
    %325 = vector.extract_strided_slice %316 {offsets = [0, 96], sizes = [2, 32], strides = [1, 1]} : vector<2x128xf32> to vector<2x32xf32>
    %326 = arith.mulf %324, %325 : vector<2x32xf32>
    %327 = arith.addf %323, %326 : vector<2x32xf32>
    %328 = math.tanh %327 : vector<2x32xf32>
    %329 = vector.extract_strided_slice %322 {offsets = [0, 32], sizes = [2, 32], strides = [1, 1]} : vector<2x64xf32> to vector<2x32xf32>
    %330 = arith.subf %287, %328 : vector<2x32xf32>
    %331 = arith.mulf %329, %330 : vector<2x32xf32>
    %332 = arith.addf %328, %331 : vector<2x32xf32>
    %333 = vector.extract_strided_slice %13 {offsets = [7, 0], sizes = [1, 96], strides = [1, 1]} : vector<8x96xf32> to vector<1x96xf32>
    %334 = vector.extract_strided_slice %18 {offsets = [7, 0], sizes = [1, 96], strides = [1, 1]} : vector<8x96xf32> to vector<1x96xf32>
    %335 = tpu.concatenate %333, %334 in 0 : vector<1x96xf32>, vector<1x96xf32> -> vector<2x96xf32>
    %cst_51 = arith.constant dense<0.000000e+00> : vector<2x96xf32>
    %336 = tpu.matmul %311, %7, %cst_51 {dimension_numbers = #tpu.dot_dimension_numbers<[1], [0], [0], [1], [0, 0, 1, 1], [], []>} : vector<2x32xf32>, vector<32x96xf32>, vector<2x96xf32> -> vector<2x96xf32>
    %337 = vector.broadcast %4 : vector<1x96xf32> to vector<2x96xf32>
    %338 = arith.addf %336, %337 : vector<2x96xf32>
    %339 = vector.extract_strided_slice %335 {offsets = [0, 0], sizes = [2, 64], strides = [1, 1]} : vector<2x96xf32> to vector<2x64xf32>
    %340 = vector.extract_strided_slice %338 {offsets = [0, 0], sizes = [2, 64], strides = [1, 1]} : vector<2x96xf32> to vector<2x64xf32>
    %341 = arith.addf %339, %340 : vector<2x64xf32>
    %342 = arith.negf %341 : vector<2x64xf32>
    %343 = math.exp %342 : vector<2x64xf32>
    %cst_52 = arith.constant 1.000000e+00 : f32
    %344 = vector.broadcast %cst_52 : f32 to vector<2x64xf32>
    %345 = arith.addf %344, %343 : vector<2x64xf32>
    %346 = arith.divf %344, %345 : vector<2x64xf32>
    %347 = vector.extract_strided_slice %335 {offsets = [0, 64], sizes = [2, 32], strides = [1, 1]} : vector<2x96xf32> to vector<2x32xf32>
    %348 = vector.extract_strided_slice %346 {offsets = [0, 0], sizes = [2, 32], strides = [1, 1]} : vector<2x64xf32> to vector<2x32xf32>
    %349 = vector.extract_strided_slice %338 {offsets = [0, 64], sizes = [2, 32], strides = [1, 1]} : vector<2x96xf32> to vector<2x32xf32>
    %350 = arith.mulf %348, %349 : vector<2x32xf32>
    %351 = arith.addf %347, %350 : vector<2x32xf32>
    %352 = math.tanh %351 : vector<2x32xf32>
    %353 = vector.extract_strided_slice %346 {offsets = [0, 32], sizes = [2, 32], strides = [1, 1]} : vector<2x64xf32> to vector<2x32xf32>
    %354 = arith.subf %311, %352 : vector<2x32xf32>
    %355 = arith.mulf %353, %354 : vector<2x32xf32>
    %356 = arith.addf %352, %355 : vector<2x32xf32>
    %cst_53 = arith.constant dense<0.000000e+00> : vector<2x128xf32>
    %357 = tpu.matmul %356, %0, %cst_53 {dimension_numbers = #tpu.dot_dimension_numbers<[1], [0], [0], [1], [0, 0, 1, 1], [], []>} : vector<2x32xf32>, vector<32x128xf32>, vector<2x128xf32> -> vector<2x128xf32>
    %cst_54 = arith.constant dense<0.000000e+00> : vector<2x128xf32>
    %358 = tpu.matmul %332, %1, %cst_54 {dimension_numbers = #tpu.dot_dimension_numbers<[1], [0], [0], [1], [0, 0, 1, 1], [], []>} : vector<2x32xf32>, vector<32x128xf32>, vector<2x128xf32> -> vector<2x128xf32>
    %359 = arith.addf %357, %358 : vector<2x128xf32>
    %360 = vector.broadcast %2 : vector<1x128xf32> to vector<2x128xf32>
    %361 = arith.addf %359, %360 : vector<2x128xf32>
    %362 = vector.extract_strided_slice %361 {offsets = [0, 0], sizes = [2, 64], strides = [1, 1]} : vector<2x128xf32> to vector<2x64xf32>
    %363 = arith.negf %362 : vector<2x64xf32>
    %364 = math.exp %363 : vector<2x64xf32>
    %cst_55 = arith.constant 1.000000e+00 : f32
    %365 = vector.broadcast %cst_55 : f32 to vector<2x64xf32>
    %366 = arith.addf %365, %364 : vector<2x64xf32>
    %367 = arith.divf %365, %366 : vector<2x64xf32>
    %368 = vector.extract_strided_slice %361 {offsets = [0, 64], sizes = [2, 32], strides = [1, 1]} : vector<2x128xf32> to vector<2x32xf32>
    %369 = vector.extract_strided_slice %367 {offsets = [0, 0], sizes = [2, 32], strides = [1, 1]} : vector<2x64xf32> to vector<2x32xf32>
    %370 = vector.extract_strided_slice %361 {offsets = [0, 96], sizes = [2, 32], strides = [1, 1]} : vector<2x128xf32> to vector<2x32xf32>
    %371 = arith.mulf %369, %370 : vector<2x32xf32>
    %372 = arith.addf %368, %371 : vector<2x32xf32>
    %373 = math.tanh %372 : vector<2x32xf32>
    %374 = vector.extract_strided_slice %367 {offsets = [0, 32], sizes = [2, 32], strides = [1, 1]} : vector<2x64xf32> to vector<2x32xf32>
    %375 = arith.subf %332, %373 : vector<2x32xf32>
    %376 = arith.mulf %374, %375 : vector<2x32xf32>
    %377 = arith.addf %373, %376 : vector<2x32xf32>
    %378 = vector.broadcast %5 : vector<1x32xf32> to vector<2x32xf32>
    %379 = arith.mulf %377, %378 : vector<2x32xf32>
    %cst_56 = arith.constant dense<0.000000e+00> : vector<2xf32>
    %380 = vector.multi_reduction <add>, %379, %cst_56 [1] : vector<2x32xf32> to vector<2xf32>
    %381 = vector.shape_cast %380 : vector<2xf32> to vector<2x1xf32>
    %382 = vector.broadcast %6 : vector<1x1xf32> to vector<2x1xf32>
    %383 = arith.addf %381, %382 : vector<2x1xf32>
    %c0_57 = arith.constant 0 : index
    %c0_58 = arith.constant 0 : index
    %384 = vector.load %arg4[%c0_57, %c0_58] : memref<2x1xf32, #tpu.memory_space<vmem>>, vector<2x1xf32>
    tpu.vector_store %arg4[%c0_57, %c0_58], %383 {strides = array<i32>} : memref<2x1xf32, #tpu.memory_space<vmem>>, vector<2x1xf32>,
    %c0_59 = arith.constant 0 : index
    %c0_60 = arith.constant 0 : index
    %385 = vector.load %arg1[%c0_59, %c0_60] : memref<2x1xf32, #tpu.memory_space<vmem>>, vector<2x1xf32>
    %386 = arith.subf %383, %385 : vector<2x1xf32>
    %387 = arith.mulf %386, %386 : vector<2x1xf32>
    %388 = vector.shape_cast %387 : vector<2x1xf32> to vector<1x2x1xf32>
    %cst_61 = arith.constant dense<0.000000e+00> : vector<1xf32>
    %389 = vector.multi_reduction <add>, %388, %cst_61 [1, 2] : vector<1x2x1xf32> to vector<1xf32>
    %390 = vector.shape_cast %389 : vector<1xf32> to vector<1x1x1xf32>
    %391 = vector.extract %390[0, 0, 0] : f32 from vector<1x1x1xf32>
    %392 = vector.broadcast %391 : f32 to vector<1x1xf32>
    %cst_62 = arith.constant 2.000000e+00 : f32
    %393 = vector.broadcast %cst_62 : f32 to vector<1x1xf32>
    %394 = arith.divf %392, %393 : vector<1x1xf32>
    %c0_63 = arith.constant 0 : index
    %c0_64 = arith.constant 0 : index
    %395 = vector.load %arg3[%c0_63, %c0_64] : memref<1x1xf32, #tpu.memory_space<vmem>>, vector<1x1xf32>
    tpu.vector_store %arg3[%c0_63, %c0_64], %394 {strides = array<i32>} : memref<1x1xf32, #tpu.memory_space<vmem>>, vector<1x1xf32>,
    return
  }
}

</mosaic_0001>

<bundles_post_ra>
// kernel: example_regression_forward.1
= control target key start
LH: loop header
LB: loop body
LE: loop exit
PB: predicated region body
PF: predicated region fallthrough
CT: control target
= control target key end

     0   :  { %10 = vsyncpa [#allocation3], 0  ;;  %s3480_s0 = inlined_call_operand.vmem [shape: f32[2,8,4], index: 0, kind: input, shape index: {}]   ;;  %s3481_s1 = inlined_call_operand.vmem [shape: f32[2,1], index: 1, kind: input, shape index: {}]   ;;  %s3482_s2 = inlined_call_operand.hbm [shape: f32[112,128], index: 2, kind: input, shape index: {}]   ;;  %s3483_s3 = inlined_call_operand.hbm [shape: f32[1,1], index: 3, kind: output, shape index: {0}]   ;;  %s3484_s4 = inlined_call_operand.vmem [shape: f32[2,1], index: 4, kind: output, shape index: {1}]  }
   0x1   :  { %11 = vsyncpa [#allocation4], 0  ;;  %s2975_s15 = smov [#allocation2]  }
   0x2   :  { %s21_s16 = sshll.u32 %s2975_s15, 4  ;;  %s22_s16 = int_to_ptr.vmem [resolvable:$true] %s21_s16 }
   0x3   :  { %s2939_s17 = scalar_lea.vmem %s22_s16, 1792  ;;  %p2944_p1 = scmp.lt.s32.totalorder %s22_s16, %s22_s16 }
   0x4   :  { %p2940_p0 = scmp.ne.s32.totalorder %s22_s16, %s2939_s17  ;;  %p2945_p2 = scmp.lt.s32.totalorder %s2939_s17, %s2939_s17 }
   0x6   :  { %p2946_p3 = por %p2945_p2, %p2944_p1 }
   0x8   :  { %p2947_p4 = pnand %p2946_p3, %p2940_p0 }
   0xa   :  { %2950 = shalt.err (!%p2947_p4)
}
   0xb   :  { %s2976_s18 = smov 128   ;;  %s2977_s19 = smov 8  }
   0xc   :  { %27 = dma.hbm_to_vmem [thread:$0]  %s3482_s2, 1792, %s22_s16, [#allocation3], %s2976_s18, %s2976_s18, %s2977_s19  }
   0xd   :  { %2971 = dma.done.wait [#allocation3], 1792  }
   0xe   :  { %2972 = vsyncadd [#allocation3], 4294965504  ;;  %v2978_v0 = vmov 0.0   ;;  %vm2979_vm0 = vmmov 0   ;;  %vm57_vm1 = vcmask 1043456   ;;  %vm53_vm2 = vcmask 31744  }
   0xf   :  { %2562 = vmatprep.subr.mxu0 %v2978_v0  ;;  %2567 = vmatprep.subr.mxu1 %v2978_v0  ;;  %v47_v1 = vld [vmem:[#allocation2 + $0x68] sm:$0xf]  ;;  %v48_v2 = vld [vmem:[%s3480_s0] sm:$0xff]  ;;  %s2980_s25 = smov 64   ;;  %vm209_vm3 = vcmask 1040384   ;;  %v3059_v45 = vld [vmem:[#allocation2 + $0x18] sm:$0xff] }
  0x10   :  { %2564 = vmatprep.mubr.msk.f32.mxu0 %vm2979_vm0, %v2978_v0  ;;  %2569 = vmatprep.mubr.msk.f32.mxu1 %vm2979_vm0, %v2978_v0  ;;  %v2404_v3 = vld [vmem:[%s3480_s0 + $0x8] sm:$0xff]  ;;  %v3024_v4 = vld [vmem:[#allocation2 + $0x42] ss:$0 sm:$0xff]  ;;  %v2401_v5 = vld [vmem:[#allocation2 + $0x41] ss:$0 sm:$0xff]  ;;  %s2981_s0 = smov 96  }
  0x11   :  { %2563 = vmatpush3.msk.msra.mxu0 %vm57_vm1, %v47_v1  ;;  %2568 = vmatpush3.msk.msra.mxu1 %vm57_vm1, %v47_v1  ;;  %v3061_v46 = vld [vmem:[#allocation2 + $0x60] sm:$0xff]  ;;  %v3063_v47 = vld [vmem:[#allocation2 + $0x10] sm:$0xff]  ;;  %v3067_v48 = vld [vmem:[#allocation2 + $0x58] sm:$0xff]  ;;  %s2982_s26 = smov 32   ;;  %vm251_vm4 = vcmask 261120   ;;  %vm2345_vm5 = vcmask 254976  }
  0x12   :  { %2565 = vmatmul.mubr.msk.f32.vlgmr.msra.gmra.mxu0 %vm53_vm2, %v48_v2  ;;  %2570 = vmatmul.mubr.msk.f32.vlgmr.msra.gmra.mxu1 %vm53_vm2, %v2404_v3  ;;  %v3071_v49 = vld [vmem:[#allocation2 + $0x8] sm:$0xff]  ;;  %v3073_v50 = vld [vmem:[#allocation2 + $0x50] sm:$0xff]  ;;  %v3088_v54 = vld [vmem:[#allocation2] sm:$0xff]  ;;  %vm2354_vm6 = vcmask 1024   ;;  %vm2380_vm7 = vcmask 0  }
  0x13   :  { %223 = vrot.lane.b32.xlu0 %v3024_v4, %s2980_s25  ;;  %2572 = vmatprep.subr.mxu0 %v2978_v0  ;;  %v3079_v51 = vld [vmem:[#allocation2 + $0x48] sm:$0xff]  ;;  %v3107_v58 = vld [vmem:[#allocation2 + $0x40] ss:$0 sm:$0xff] }
  0x14   :  { %2583 = vmatprep.subr.mxu1 %v2978_v0  ;;  %2580 = vmatprep.mubr.msk.f32.mxu0 %vm2979_vm0, %v2978_v0 }
  0x15   :  { %2591 = vmatprep.mubr.msk.f32.mxu1 %vm2979_vm0, %v2978_v0  ;;  %2573 = vmatpush3.msra.mxu0 %v3059_v45 }
  0x16   :  { %2584 = vmatpush3.msra.mxu1 %v3061_v46  ;;  %2574 = vmatprep.subr.mxu0 %v2978_v0 }
  0x17   :  { %2585 = vmatprep.subr.mxu1 %v2978_v0  ;;  %2575 = vmatpush3.msra.mxu0 %v3063_v47 }
  0x18   :  { %2586 = vmatpush3.msra.mxu1 %v3067_v48  ;;  %2576 = vmatprep.subr.mxu0 %v2978_v0 }
  0x19   :  { %2587 = vmatprep.subr.mxu1 %v2978_v0  ;;  %2577 = vmatpush3.msra.mxu0 %v3071_v49 }
  0x1a   :  { %2588 = vmatpush3.msra.mxu1 %v3073_v50  ;;  %2578 = vmatprep.subr.mxu0 %v2978_v0 }
  0x1b   :  { %2589 = vmatprep.subr.mxu1 %v2978_v0  ;;  %2579 = vmatpush3.msra.mxu0 %v3088_v54 }
  0x1c   :  { %2590 = vmatpush3.msra.mxu1 %v3079_v51  ;;  %2594 = vmatprep.subr.mxu0 %v2978_v0 }
  0x1d   :  { %2605 = vmatprep.subr.mxu1 %v2978_v0 }
  0x85   :  { %v224_v38 = vpop.permute.xlu0 %223 }
  0xd2   :  { %v127_v6 = vpop.f32.mrf.mxu0  ;;  %v202_v7 = vpop.f32.mrf.mxu1 }
  0xd3   :  { %v128_v8 = vadd.f32 %v2401_v5, %v127_v6  ;;  %v203_v9 = vadd.f32 %v2401_v5, %v202_v7 }
  0xd4   :  { %v2566_v10 = vpop.f32.mrf.mxu0  ;;  %v2571_v11 = vpop.f32.mrf.mxu1 }
  0xd5   :  { %v207_v12 = vrot.slane %v203_v9, 7  ;;  %v353_v13 = vrot.slane %v128_v8, 1  ;;  %v634_v14 = vrot.slane %v128_v8, 2  ;;  %v636_v15 = vrot.slane %v203_v9, 1 }
  0xd6   :  { %v917_v16 = vrot.slane %v128_v8, 3  ;;  %v919_v17 = vrot.slane %v203_v9, 2  ;;  %v1200_v18 = vrot.slane %v128_v8, 4  ;;  %v1202_v19 = vrot.slane %v203_v9, 3 }
  0xd7   :  { %v210_v20 = vsel %vm209_vm3, %v128_v8, %v207_v12  ;;  %v3036_v21 = vsel %vm209_vm3, %v353_v13, %v203_v9  ;;  %v3039_v22 = vsel %vm209_vm3, %v634_v14, %v636_v15  ;;  %v1483_v23 = vrot.slane %v128_v8, 5 }
  0xd8   :  { %v215_v24 = vadd.f32 %v3024_v4, %v210_v20  ;;  %v3043_v25 = vsel %vm209_vm3, %v917_v16, %v919_v17  ;;  %v3046_v26 = vsel %vm209_vm3, %v1200_v18, %v1202_v19  ;;  %v1485_v27 = vrot.slane %v203_v9, 4 }
  0xd9   :  { %v1766_v28 = vrot.slane %v128_v8, 6  ;;  %v1768_v29 = vrot.slane %v203_v9, 5  ;;  %v2049_v30 = vrot.slane %v128_v8, 7  ;;  %v2051_v31 = vrot.slane %v203_v9, 6 }
  0xda   :  { %v2408_v32 = vmul.f32 -1.442695, %v215_v24  ;;  %v3049_v33 = vsel %vm209_vm3, %v1483_v23, %v1485_v27 }
  0xdb   :  { %v3052_v34 = vsel %vm209_vm3, %v1766_v28, %v1768_v29  ;;  %v3055_v35 = vsel %vm209_vm3, %v2049_v30, %v2051_v31  ;;  %v3119_v28 = vld [vmem:[#allocation2 + $0x38] sm:$0xff]  ;;  %v3121_v29 = vld [vmem:[#allocation2 + $0x30] sm:$0xff]  ;;  %v3129_v30 = vld [vmem:[#allocation2 + $0x20] sm:$0xff] }
  0xdc   :  { %2825 = vpow2.f32 %v2408_v32 }
  0xe9   :  { %v2826_v36 = vpop.eup %2825 }
  0xea   :  { %v219_v37 = vadd.f32 1.0, %v2826_v36 }
  0xec   :  { %2827 = vrcp.f32 %v219_v37 }
  0xf9   :  { %v2828_v39 = vpop.eup %2827 }
  0xfa   :  { %v226_v40 = vmul.f32 %v2828_v39, %v224_v38 }
  0xfc   :  { %228 = vrot.lane.b32.xlu0 %v226_v40, %s2980_s25 }
 0x16e   :  { %v229_v41 = vpop.permute.xlu0 %228 }
 0x16f   :  { %v231_v42 = vadd.f32 %v229_v41, %v210_v20 }
 0x171   :  { %2829 = vtanh.f32 %v231_v42 }
 0x17e   :  { %v2830_v43 = vpop.eup %2829 }
 0x17f   :  { %v233_v44 = vsub.f32 0.0, %v2830_v43 }
 0x181   :  { %235 = vrot.lane.b32.xlu1 %v233_v44, %s2981_s0 }
 0x1f3   :  { %v236_v52 = vpop.permute.xlu1 %235 }
 0x1f4   :  { %v238_v53 = vmul.f32 %v2828_v39, %v236_v52 }
 0x1f6   :  { %240 = vrot.lane.b32.xlu1 %v238_v53, %s2982_s26 }
 0x268   :  { %v241_v55 = vpop.permute.xlu1 %240 }
 0x269   :  { %v243_v56 = vadd.f32 %v2830_v43, %v241_v55 }
 0x26b   :  { %249 = vrot.lane.b32.xlu0 %v243_v56, %s2980_s25 }
 0x2dd   :  { %v250_v57 = vpop.permute.xlu0 %249 }
 0x2de   :  { %2581 = vmatmul.mubr.msk.f32.vlgmr.msra.gmra.mxu0 %vm251_vm4, %v250_v57  ;;  %2592 = vmatmul.mubr.msk.f32.vlgmr.msra.gmra.mxu1 %vm251_vm4, %v250_v57 }
 0x2df   :  { %2606 = vmatpush3.msra.mxu1 %v3059_v45  ;;  %2613 = vmatprep.mubr.msk.f32.mxu1 %vm2979_vm0, %v2978_v0 }
 0x2e0   :  { %2607 = vmatprep.subr.mxu1 %v2978_v0  ;;  %2602 = vmatprep.mubr.msk.f32.mxu0 %vm2979_vm0, %v2978_v0 }
 0x2e1   :  { %2608 = vmatpush3.msra.mxu1 %v3063_v47  ;;  %2595 = vmatpush3.msra.mxu0 %v3119_v28 }
 0x2e2   :  { %2609 = vmatprep.subr.mxu1 %v2978_v0  ;;  %2596 = vmatprep.subr.mxu0 %v2978_v0 }
 0x2e3   :  { %2610 = vmatpush3.msra.mxu1 %v3071_v49  ;;  %2597 = vmatpush3.msra.mxu0 %v3121_v29 }
 0x2e4   :  { %2611 = vmatprep.subr.mxu1 %v2978_v0  ;;  %2598 = vmatprep.subr.mxu0 %v2978_v0 }
 0x2e5   :  { %2612 = vmatpush3.msra.mxu1 %v3088_v54 }
 0x2e6   :  { %2627 = vmatprep.subr.mxu1 %v2978_v0 }
 0x39e   :  { %v320_v59 = vpop.f32.mrf.mxu0  ;;  %v422_v60 = vpop.f32.mrf.mxu1 }
 0x39f   :  { %v321_v61 = vadd.f32 %v3107_v58, %v320_v59  ;;  %v423_v62 = vadd.f32 %v3024_v4, %v422_v60 }
 0x3a0   :  { %v2582_v63 = vpop.f32.mrf.mxu0  ;;  %v2593_v1 = vpop.f32.mrf.mxu1 }
 0x3a1   :  { %434 = vrot.lane.b32.xlu0 %v423_v62, %s2980_s25  ;;  %331 = vrot.lane.b32.xlu1 %v321_v61, %s2982_s26  ;;  %v426_v2 = vadd.f32 %v423_v62, %v3036_v21  ;;  %v2411_v3 = vmul.f32 -1.442695, %v321_v61 }
 0x3a3   :  { %v2413_v5 = vmul.f32 -1.442695, %v426_v2  ;;  %2831 = vpow2.f32 %v2411_v3 }
 0x3a5   :  { %2833 = vpow2.f32 %v2413_v5 }
 0x3b0   :  { %v2832_v6 = vpop.eup %2831 }
 0x3b1   :  { %v327_v8 = vadd.f32 1.0, %v2832_v6 }
 0x3b2   :  { %v2834_v7 = vpop.eup %2833 }
 0x3b3   :  { %v430_v9 = vadd.f32 1.0, %v2834_v7  ;;  %2835 = vrcp.f32 %v327_v8 }
 0x3b5   :  { %2837 = vrcp.f32 %v430_v9 }
 0x3c0   :  { %v2836_v10 = vpop.eup %2835 }
 0x3c2   :  { %v2838_v11 = vpop.eup %2837 }
 0x413   :  { %v435_v12 = vpop.permute.xlu0 %434  ;;  %v332_v13 = vpop.permute.xlu1 %331 }
 0x414   :  { %v437_v14 = vmul.f32 %v2838_v11, %v435_v12  ;;  %v334_v15 = vmul.f32 %v2836_v10, %v332_v13 }
 0x416   :  { %439 = vrot.lane.b32.xlu0 %v437_v14, %s2980_s25  ;;  %336 = vrot.lane.b32.xlu1 %v334_v15, %s2980_s25 }
 0x488   :  { %v440_v16 = vpop.permute.xlu0 %439  ;;  %v337_v17 = vpop.permute.xlu1 %336 }
 0x489   :  { %v442_v18 = vadd.f32 %v440_v16, %v3036_v21  ;;  %v339_v19 = vadd.f32 %v337_v17, %v321_v61  ;;  %v3125_v21 = vld [vmem:[#allocation2 + $0x28] sm:$0xff] }
 0x48a   :  { %2599 = vmatpush3.msra.mxu0 %v3125_v21 }
 0x48b   :  { %2839 = vtanh.f32 %v442_v18  ;;  %2600 = vmatprep.subr.mxu0 %v2978_v0 }
 0x48c   :  { %2841 = vtanh.f32 %v339_v19  ;;  %2601 = vmatpush3.msra.mxu0 %v3129_v30 }
 0x48d   :  { %2616 = vmatprep.subr.mxu0 %v2978_v0 }
 0x498   :  { %v2840_v20 = vpop.eup %2839 }
 0x499   :  { %v2842_v23 = vpop.eup %2841  ;;  %v444_v24 = vsub.f32 %v243_v56, %v2840_v20 }
 0x49a   :  { %v341_v27 = vsub.f32 0.0, %v2842_v23 }
 0x49b   :  { %446 = vrot.lane.b32.xlu0 %v444_v24, %s2981_s0 }
 0x49c   :  { %343 = vrot.lane.b32.xlu1 %v341_v27, %s2981_s0 }
 0x50d   :  { %v447_v31 = vpop.permute.xlu0 %446 }
 0x50e   :  { %v449_v32 = vmul.f32 %v2838_v11, %v447_v31  ;;  %v344_v36 = vpop.permute.xlu1 %343 }
 0x50f   :  { %v346_v37 = vmul.f32 %v2836_v10, %v344_v36 }
 0x510   :  { %451 = vrot.lane.b32.xlu0 %v449_v32, %s2982_s26 }
 0x511   :  { %348 = vrot.lane.b32.xlu1 %v346_v37, %s2982_s26 }
 0x582   :  { %v452_v38 = vpop.permute.xlu0 %451 }
 0x583   :  { %v3137_v39 = vadd.f32 %v2840_v20, %v452_v38  ;;  %v349_v40 = vpop.permute.xlu1 %348 }
 0x584   :  { %v3139_v41 = vadd.f32 %v2842_v23, %v349_v40 }
 0x585   :  { %531 = vrot.lane.b32.xlu0 %v3137_v39, %s2980_s25 }
 0x586   :  { %456 = vrot.lane.b32.xlu1 %v3139_v41, %s2980_s25 }
 0x5f7   :  { %v532_v42 = vpop.permute.xlu0 %531 }
 0x5f8   :  { %v457_v43 = vpop.permute.xlu1 %456  ;;  %2614 = vmatmul.mubr.msk.f32.vlgmr.msra.gmra.mxu1 %vm251_vm4, %v532_v42 }
 0x5f9   :  { %2603 = vmatmul.mubr.msk.f32.vlgmr.msra.gmra.mxu0 %vm251_vm4, %v457_v43  ;;  %2628 = vmatpush3.msra.mxu1 %v3119_v28 }
 0x5fa   :  { %2617 = vmatpush3.msra.mxu0 %v3061_v46  ;;  %2624 = vmatprep.mubr.msk.f32.mxu0 %vm2979_vm0, %v2978_v0 }
 0x5fb   :  { %2618 = vmatprep.subr.mxu0 %v2978_v0  ;;  %2629 = vmatprep.subr.mxu1 %v2978_v0 }
 0x5fc   :  { %2619 = vmatpush3.msra.mxu0 %v3067_v48  ;;  %2630 = vmatpush3.msra.mxu1 %v3121_v29 }
 0x5fd   :  { %2620 = vmatprep.subr.mxu0 %v2978_v0  ;;  %2631 = vmatprep.subr.mxu1 %v2978_v0 }
 0x5fe   :  { %2621 = vmatpush3.msra.mxu0 %v3073_v50  ;;  %2632 = vmatpush3.msra.mxu1 %v3125_v21 }
 0x5ff   :  { %2622 = vmatprep.subr.mxu0 %v2978_v0  ;;  %2633 = vmatprep.subr.mxu1 %v2978_v0 }
 0x600   :  { %2623 = vmatpush3.msra.mxu0 %v3079_v51  ;;  %2634 = vmatpush3.msra.mxu1 %v3129_v30 }
 0x601   :  { %2625 = vmatmul.mubr.msk.f32.vlgmr.msra.gmra.mxu0 %vm251_vm4, %v532_v42  ;;  %2638 = vmatprep.subr.mxu0 %v2978_v0 }
 0x602   :  { %2639 = vmatpush3.msra.mxu0 %v3059_v45  ;;  %2635 = vmatprep.mubr.msk.f32.mxu1 %vm2979_vm0, %v2978_v0 }
 0x603   :  { %2640 = vmatprep.subr.mxu0 %v2978_v0  ;;  %2649 = vmatprep.subr.mxu1 %v2978_v0 }
 0x604   :  { %2641 = vmatpush3.msra.mxu0 %v3063_v47  ;;  %2646 = vmatprep.mubr.msk.f32.mxu0 %vm2979_vm0, %v2978_v0 }
 0x605   :  { %2642 = vmatprep.subr.mxu0 %v2978_v0 }
 0x606   :  { %2643 = vmatpush3.msra.mxu0 %v3071_v49 }
 0x607   :  { %2644 = vmatprep.subr.mxu0 %v2978_v0 }
 0x608   :  { %2645 = vmatpush3.msra.mxu0 %v3088_v54 }
 0x609   :  { %2660 = vmatprep.subr.mxu0 %v2978_v0 }
 0x6b8   :  { %v601_v44 = vpop.f32.mrf.mxu1 }
 0x6b9   :  { %v526_v52 = vpop.f32.mrf.mxu0 }
 0x6ba   :  { %v602_v53 = vadd.f32 %v601_v44, %v526_v52  ;;  %v2615_v55 = vpop.f32.mrf.mxu1 }
 0x6bb   :  { %v2604_v56 = vpop.f32.mrf.mxu0 }
 0x6bc   :  { %v605_v57 = vadd.f32 %v3107_v58, %v602_v53 }
 0x6be   :  { %613 = vrot.lane.b32.xlu1 %v605_v57, %s2982_s26  ;;  %v2416_v62 = vmul.f32 -1.442695, %v605_v57 }
 0x6c0   :  { %2843 = vpow2.f32 %v2416_v62 }
 0x6c1   :  { %v705_v59 = vpop.f32.mrf.mxu0 }
 0x6c2   :  { %v706_v60 = vadd.f32 %v3024_v4, %v705_v59 }
 0x6c3   :  { %v2626_v61 = vpop.f32.mrf.mxu0 }
 0x6c4   :  { %717 = vrot.lane.b32.xlu0 %v706_v60, %s2980_s25  ;;  %v709_v63 = vadd.f32 %v706_v60, %v3039_v22 }
 0x6c6   :  { %v2418_v1 = vmul.f32 -1.442695, %v709_v63 }
 0x6c8   :  { %2845 = vpow2.f32 %v2418_v1 }
 0x6cd   :  { %v2844_v2 = vpop.eup %2843 }
 0x6ce   :  { %v609_v3 = vadd.f32 1.0, %v2844_v2 }
 0x6d0   :  { %2847 = vrcp.f32 %v609_v3 }
 0x6d5   :  { %v2846_v5 = vpop.eup %2845 }
 0x6d6   :  { %v713_v6 = vadd.f32 1.0, %v2846_v5 }
 0x6d8   :  { %2849 = vrcp.f32 %v713_v6 }
 0x6dd   :  { %v2848_v7 = vpop.eup %2847 }
 0x6e5   :  { %v2850_v10 = vpop.eup %2849 }
 0x730   :  { %v614_v8 = vpop.permute.xlu1 %613 }
 0x731   :  { %v616_v9 = vmul.f32 %v2848_v7, %v614_v8 }
 0x733   :  { %618 = vrot.lane.b32.xlu1 %v616_v9, %s2980_s25 }
 0x736   :  { %v718_v11 = vpop.permute.xlu0 %717 }
 0x737   :  { %v720_v12 = vmul.f32 %v2850_v10, %v718_v11 }
 0x739   :  { %722 = vrot.lane.b32.xlu0 %v720_v12, %s2980_s25 }
 0x7a5   :  { %v619_v13 = vpop.permute.xlu1 %618 }
 0x7a6   :  { %v621_v14 = vadd.f32 %v619_v13, %v605_v57 }
 0x7a8   :  { %2851 = vtanh.f32 %v621_v14 }
 0x7ab   :  { %v723_v15 = vpop.permute.xlu0 %722 }
 0x7ac   :  { %v725_v16 = vadd.f32 %v723_v15, %v3039_v22 }
 0x7ae   :  { %2853 = vtanh.f32 %v725_v16 }
 0x7b5   :  { %v2852_v17 = vpop.eup %2851 }
 0x7b6   :  { %v623_v18 = vsub.f32 %v3139_v41, %v2852_v17 }
 0x7b8   :  { %625 = vrot.lane.b32.xlu1 %v623_v18, %s2981_s0 }
 0x7bb   :  { %v2854_v19 = vpop.eup %2853 }
 0x7bc   :  { %v727_v20 = vsub.f32 %v3137_v39, %v2854_v19 }
 0x7be   :  { %729 = vrot.lane.b32.xlu0 %v727_v20, %s2981_s0 }
 0x82a   :  { %v626_v23 = vpop.permute.xlu1 %625 }
 0x82b   :  { %v628_v24 = vmul.f32 %v2848_v7, %v626_v23 }
 0x82d   :  { %630 = vrot.lane.b32.xlu1 %v628_v24, %s2982_s26 }
 0x830   :  { %v730_v27 = vpop.permute.xlu0 %729 }
 0x831   :  { %v732_v31 = vmul.f32 %v2850_v10, %v730_v27 }
 0x833   :  { %734 = vrot.lane.b32.xlu0 %v732_v31, %s2982_s26 }
 0x89f   :  { %v631_v22 = vpop.permute.xlu1 %630 }
 0x8a0   :  { %v3192_v32 = vadd.f32 %v2852_v17, %v631_v22 }
 0x8a2   :  { %739 = vrot.lane.b32.xlu1 %v3192_v32, %s2980_s25 }
 0x8a5   :  { %v735_v36 = vpop.permute.xlu0 %734 }
 0x8a6   :  { %v3196_v37 = vadd.f32 %v2854_v19, %v735_v36 }
 0x8a8   :  { %814 = vrot.lane.b32.xlu0 %v3196_v37, %s2980_s25 }
 0x914   :  { %v740_v38 = vpop.permute.xlu1 %739 }
 0x915   :  { %2636 = vmatmul.mubr.msk.f32.vlgmr.msra.gmra.mxu1 %vm251_vm4, %v740_v38 }
 0x916   :  { %2650 = vmatpush3.msra.mxu1 %v3061_v46  ;;  %2657 = vmatprep.mubr.msk.f32.mxu1 %vm2979_vm0, %v2978_v0 }
 0x917   :  { %2651 = vmatprep.subr.mxu1 %v2978_v0 }
 0x918   :  { %2652 = vmatpush3.msra.mxu1 %v3067_v48 }
 0x919   :  { %2653 = vmatprep.subr.mxu1 %v2978_v0 }
 0x91a   :  { %2654 = vmatpush3.msra.mxu1 %v3073_v50  ;;  %v815_v39 = vpop.permute.xlu0 %814 }
 0x91b   :  { %2647 = vmatmul.mubr.msk.f32.vlgmr.msra.gmra.mxu0 %vm251_vm4, %v815_v39  ;;  %2655 = vmatprep.subr.mxu1 %v2978_v0 }
 0x91c   :  { %2656 = vmatpush3.msra.mxu1 %v3079_v51  ;;  %2661 = vmatpush3.msra.mxu0 %v3119_v28 }
 0x91d   :  { %2658 = vmatmul.mubr.msk.f32.vlgmr.msra.gmra.mxu1 %vm251_vm4, %v815_v39  ;;  %2671 = vmatprep.subr.mxu1 %v2978_v0 }
 0x91e   :  { %2662 = vmatprep.subr.mxu0 %v2978_v0  ;;  %2672 = vmatpush3.msra.mxu1 %v3059_v45 }
 0x91f   :  { %2663 = vmatpush3.msra.mxu0 %v3121_v29  ;;  %2673 = vmatprep.subr.mxu1 %v2978_v0 }
 0x920   :  { %2664 = vmatprep.subr.mxu0 %v2978_v0  ;;  %2674 = vmatpush3.msra.mxu1 %v3063_v47 }
 0x921   :  { %2665 = vmatpush3.msra.mxu0 %v3125_v21  ;;  %2675 = vmatprep.subr.mxu1 %v2978_v0 }
 0x922   :  { %2666 = vmatprep.subr.mxu0 %v2978_v0  ;;  %2676 = vmatpush3.msra.mxu1 %v3071_v49 }
 0x923   :  { %2667 = vmatpush3.msra.mxu0 %v3129_v30  ;;  %2677 = vmatprep.subr.mxu1 %v2978_v0 }
 0x924   :  { %2678 = vmatpush3.msra.mxu1 %v3088_v54  ;;  %2679 = vmatprep.mubr.msk.f32.mxu1 %vm2979_vm0, %v2978_v0 }
 0x925   :  { %2668 = vmatprep.mubr.msk.f32.mxu0 %vm2979_vm0, %v2978_v0  ;;  %2682 = vmatprep.subr.mxu0 %v2978_v0 }
 0x926   :  { %2693 = vmatprep.subr.mxu1 %v2978_v0 }
 0x9d5   :  { %v809_v40 = vpop.f32.mrf.mxu1 }
 0x9d7   :  { %v2637_v41 = vpop.f32.mrf.mxu1 }
 0x9db   :  { %v884_v42 = vpop.f32.mrf.mxu0 }
 0x9dc   :  { %v885_v43 = vadd.f32 %v884_v42, %v809_v40 }
 0x9dd   :  { %v2648_v44 = vpop.f32.mrf.mxu0  ;;  %v988_v52 = vpop.f32.mrf.mxu1 }
 0x9de   :  { %v888_v53 = vadd.f32 %v3107_v58, %v885_v43  ;;  %v989_v55 = vadd.f32 %v3024_v4, %v988_v52 }
 0x9df   :  { %v2659_v56 = vpop.f32.mrf.mxu1 }
 0x9e0   :  { %1000 = vrot.lane.b32.xlu0 %v989_v55, %s2980_s25  ;;  %896 = vrot.lane.b32.xlu1 %v888_v53, %s2982_s26  ;;  %v992_v57 = vadd.f32 %v989_v55, %v3043_v25  ;;  %v2421_v59 = vmul.f32 -1.442695, %v888_v53 }
 0x9e2   :  { %v2423_v60 = vmul.f32 -1.442695, %v992_v57  ;;  %2855 = vpow2.f32 %v2421_v59 }
 0x9e4   :  { %2857 = vpow2.f32 %v2423_v60 }
 0x9ef   :  { %v2856_v61 = vpop.eup %2855 }
 0x9f0   :  { %v892_v63 = vadd.f32 1.0, %v2856_v61 }
 0x9f1   :  { %v2858_v62 = vpop.eup %2857 }
 0x9f2   :  { %v996_v1 = vadd.f32 1.0, %v2858_v62  ;;  %2859 = vrcp.f32 %v892_v63 }
 0x9f4   :  { %2861 = vrcp.f32 %v996_v1 }
 0x9ff   :  { %v2860_v2 = vpop.eup %2859 }
 0xa01   :  { %v2862_v3 = vpop.eup %2861 }
 0xa52   :  { %v1001_v5 = vpop.permute.xlu0 %1000  ;;  %v897_v6 = vpop.permute.xlu1 %896 }
 0xa53   :  { %v1003_v7 = vmul.f32 %v2862_v3, %v1001_v5  ;;  %v899_v8 = vmul.f32 %v2860_v2, %v897_v6 }
 0xa55   :  { %1005 = vrot.lane.b32.xlu0 %v1003_v7, %s2980_s25  ;;  %901 = vrot.lane.b32.xlu1 %v899_v8, %s2980_s25 }
 0xac7   :  { %v1006_v9 = vpop.permute.xlu0 %1005  ;;  %v902_v10 = vpop.permute.xlu1 %901 }
 0xac8   :  { %v1008_v11 = vadd.f32 %v1006_v9, %v3043_v25  ;;  %v904_v12 = vadd.f32 %v902_v10, %v888_v53 }
 0xaca   :  { %2863 = vtanh.f32 %v1008_v11 }
 0xacb   :  { %2865 = vtanh.f32 %v904_v12 }
 0xad7   :  { %v2864_v13 = vpop.eup %2863 }
 0xad8   :  { %v2866_v14 = vpop.eup %2865  ;;  %v1010_v15 = vsub.f32 %v3196_v37, %v2864_v13 }
 0xad9   :  { %v906_v16 = vsub.f32 %v3192_v32, %v2866_v14 }
 0xada   :  { %1012 = vrot.lane.b32.xlu0 %v1010_v15, %s2981_s0 }
 0xadb   :  { %908 = vrot.lane.b32.xlu1 %v906_v16, %s2981_s0 }
 0xb4c   :  { %v1013_v17 = vpop.permute.xlu0 %1012 }
 0xb4d   :  { %v1015_v18 = vmul.f32 %v2862_v3, %v1013_v17  ;;  %v909_v19 = vpop.permute.xlu1 %908 }
 0xb4e   :  { %v911_v20 = vmul.f32 %v2860_v2, %v909_v19 }
 0xb4f   :  { %1017 = vrot.lane.b32.xlu0 %v1015_v18, %s2982_s26 }
 0xb50   :  { %913 = vrot.lane.b32.xlu1 %v911_v20, %s2982_s26 }
 0xbc1   :  { %v1018_v25 = vpop.permute.xlu0 %1017 }
 0xbc2   :  { %v3247_v23 = vadd.f32 %v2864_v13, %v1018_v25  ;;  %v914_v24 = vpop.permute.xlu1 %913 }
 0xbc3   :  { %v3249_v27 = vadd.f32 %v2866_v14, %v914_v24 }
 0xbc4   :  { %1097 = vrot.lane.b32.xlu0 %v3247_v23, %s2980_s25 }
 0xbc5   :  { %1022 = vrot.lane.b32.xlu1 %v3249_v27, %s2980_s25 }
 0xc36   :  { %v1098_v31 = vpop.permute.xlu0 %1097 }
 0xc37   :  { %v1023_v22 = vpop.permute.xlu1 %1022  ;;  %2680 = vmatmul.mubr.msk.f32.vlgmr.msra.gmra.mxu1 %vm251_vm4, %v1098_v31 }
 0xc38   :  { %2669 = vmatmul.mubr.msk.f32.vlgmr.msra.gmra.mxu0 %vm251_vm4, %v1023_v22  ;;  %2694 = vmatpush3.msra.mxu1 %v3119_v28 }
 0xc39   :  { %2683 = vmatpush3.msra.mxu0 %v3061_v46  ;;  %2690 = vmatprep.mubr.msk.f32.mxu0 %vm2979_vm0, %v2978_v0 }
 0xc3a   :  { %2684 = vmatprep.subr.mxu0 %v2978_v0  ;;  %2695 = vmatprep.subr.mxu1 %v2978_v0 }
 0xc3b   :  { %2685 = vmatpush3.msra.mxu0 %v3067_v48  ;;  %2696 = vmatpush3.msra.mxu1 %v3121_v29 }
 0xc3c   :  { %2686 = vmatprep.subr.mxu0 %v2978_v0  ;;  %2697 = vmatprep.subr.mxu1 %v2978_v0 }
 0xc3d   :  { %2687 = vmatpush3.msra.mxu0 %v3073_v50  ;;  %2698 = vmatpush3.msra.mxu1 %v3125_v21 }
 0xc3e   :  { %2688 = vmatprep.subr.mxu0 %v2978_v0  ;;  %2699 = vmatprep.subr.mxu1 %v2978_v0 }
 0xc3f   :  { %2689 = vmatpush3.msra.mxu0 %v3079_v51  ;;  %2700 = vmatpush3.msra.mxu1 %v3129_v30 }
 0xc40   :  { %2691 = vmatmul.mubr.msk.f32.vlgmr.msra.gmra.mxu0 %vm251_vm4, %v1098_v31  ;;  %2704 = vmatprep.subr.mxu0 %v2978_v0 }
 0xc41   :  { %2705 = vmatpush3.msra.mxu0 %v3059_v45  ;;  %2701 = vmatprep.mubr.msk.f32.mxu1 %vm2979_vm0, %v2978_v0 }
 0xc42   :  { %2706 = vmatprep.subr.mxu0 %v2978_v0  ;;  %2715 = vmatprep.subr.mxu1 %v2978_v0 }
 0xc43   :  { %2707 = vmatpush3.msra.mxu0 %v3063_v47  ;;  %2712 = vmatprep.mubr.msk.f32.mxu0 %vm2979_vm0, %v2978_v0 }
 0xc44   :  { %2708 = vmatprep.subr.mxu0 %v2978_v0 }
 0xc45   :  { %2709 = vmatpush3.msra.mxu0 %v3071_v49 }
 0xc46   :  { %2710 = vmatprep.subr.mxu0 %v2978_v0 }
 0xc47   :  { %2711 = vmatpush3.msra.mxu0 %v3088_v54 }
 0xc48   :  { %2726 = vmatprep.subr.mxu0 %v2978_v0 }
 0xcf7   :  { %v1167_v32 = vpop.f32.mrf.mxu1 }
 0xcf8   :  { %v1092_v36 = vpop.f32.mrf.mxu0 }
 0xcf9   :  { %v1168_v37 = vadd.f32 %v1167_v32, %v1092_v36  ;;  %v2681_v38 = vpop.f32.mrf.mxu1 }
 0xcfa   :  { %v2670_v39 = vpop.f32.mrf.mxu0 }
 0xcfb   :  { %v1171_v40 = vadd.f32 %v3107_v58, %v1168_v37 }
 0xcfd   :  { %1179 = vrot.lane.b32.xlu1 %v1171_v40, %s2982_s26  ;;  %v2426_v44 = vmul.f32 -1.442695, %v1171_v40 }
 0xcff   :  { %2867 = vpow2.f32 %v2426_v44 }
 0xd00   :  { %v1271_v41 = vpop.f32.mrf.mxu0 }
 0xd01   :  { %v1272_v42 = vadd.f32 %v3024_v4, %v1271_v41 }
 0xd02   :  { %v2692_v43 = vpop.f32.mrf.mxu0 }
 0xd03   :  { %1283 = vrot.lane.b32.xlu0 %v1272_v42, %s2980_s25  ;;  %v1275_v52 = vadd.f32 %v1272_v42, %v3046_v26 }
 0xd05   :  { %v2428_v53 = vmul.f32 -1.442695, %v1275_v52 }
 0xd07   :  { %2869 = vpow2.f32 %v2428_v53 }
 0xd0c   :  { %v2868_v55 = vpop.eup %2867 }
 0xd0d   :  { %v1175_v56 = vadd.f32 1.0, %v2868_v55 }
 0xd0f   :  { %2871 = vrcp.f32 %v1175_v56 }
 0xd14   :  { %v2870_v57 = vpop.eup %2869 }
 0xd15   :  { %v1279_v59 = vadd.f32 1.0, %v2870_v57 }
 0xd17   :  { %2873 = vrcp.f32 %v1279_v59 }
 0xd1c   :  { %v2872_v60 = vpop.eup %2871 }
 0xd24   :  { %v2874_v63 = vpop.eup %2873 }
 0xd6f   :  { %v1180_v61 = vpop.permute.xlu1 %1179 }
 0xd70   :  { %v1182_v62 = vmul.f32 %v2872_v60, %v1180_v61 }
 0xd72   :  { %1184 = vrot.lane.b32.xlu1 %v1182_v62, %s2980_s25 }
 0xd75   :  { %v1284_v1 = vpop.permute.xlu0 %1283 }
 0xd76   :  { %v1286_v2 = vmul.f32 %v2874_v63, %v1284_v1 }
 0xd78   :  { %1288 = vrot.lane.b32.xlu0 %v1286_v2, %s2980_s25 }
 0xde4   :  { %v1185_v3 = vpop.permute.xlu1 %1184 }
 0xde5   :  { %v1187_v5 = vadd.f32 %v1185_v3, %v1171_v40 }
 0xde7   :  { %2875 = vtanh.f32 %v1187_v5 }
 0xdea   :  { %v1289_v6 = vpop.permute.xlu0 %1288 }
 0xdeb   :  { %v1291_v7 = vadd.f32 %v1289_v6, %v3046_v26 }
 0xded   :  { %2877 = vtanh.f32 %v1291_v7 }
 0xdf4   :  { %v2876_v8 = vpop.eup %2875 }
 0xdf5   :  { %v1189_v9 = vsub.f32 %v3249_v27, %v2876_v8 }
 0xdf7   :  { %1191 = vrot.lane.b32.xlu1 %v1189_v9, %s2981_s0 }
 0xdfa   :  { %v2878_v10 = vpop.eup %2877 }
 0xdfb   :  { %v1293_v11 = vsub.f32 %v3247_v23, %v2878_v10 }
 0xdfd   :  { %1295 = vrot.lane.b32.xlu0 %v1293_v11, %s2981_s0 }
 0xe69   :  { %v1192_v12 = vpop.permute.xlu1 %1191 }
 0xe6a   :  { %v1194_v13 = vmul.f32 %v2872_v60, %v1192_v12 }
 0xe6c   :  { %1196 = vrot.lane.b32.xlu1 %v1194_v13, %s2982_s26 }
 0xe6f   :  { %v1296_v14 = vpop.permute.xlu0 %1295 }
 0xe70   :  { %v1298_v15 = vmul.f32 %v2874_v63, %v1296_v14 }
 0xe72   :  { %1300 = vrot.lane.b32.xlu0 %v1298_v15, %s2982_s26  ;;  %v3400_v15 = vld [vmem:[#allocation2 + $0x42] ss:$0 sm:$0xff] }
 0xede   :  { %v1197_v26 = vpop.permute.xlu1 %1196 }
 0xedf   :  { %v3302_v16 = vadd.f32 %v2876_v8, %v1197_v26 }
 0xee1   :  { %1305 = vrot.lane.b32.xlu1 %v3302_v16, %s2980_s25 }
 0xee4   :  { %v1301_v17 = vpop.permute.xlu0 %1300 }
 0xee5   :  { %v3306_v18 = vadd.f32 %v2878_v10, %v1301_v17 }
 0xee7   :  { %1380 = vrot.lane.b32.xlu0 %v3306_v18, %s2980_s25 }
 0xf53   :  { %v1306_v19 = vpop.permute.xlu1 %1305 }
 0xf54   :  { %2702 = vmatmul.mubr.msk.f32.vlgmr.msra.gmra.mxu1 %vm251_vm4, %v1306_v19 }
 0xf55   :  { %2716 = vmatpush3.msra.mxu1 %v3061_v46  ;;  %2723 = vmatprep.mubr.msk.f32.mxu1 %vm2979_vm0, %v2978_v0 }
 0xf56   :  { %2717 = vmatprep.subr.mxu1 %v2978_v0 }
 0xf57   :  { %2718 = vmatpush3.msra.mxu1 %v3067_v48 }
 0xf58   :  { %2719 = vmatprep.subr.mxu1 %v2978_v0 }
 0xf59   :  { %2720 = vmatpush3.msra.mxu1 %v3073_v50  ;;  %v1381_v20 = vpop.permute.xlu0 %1380 }
 0xf5a   :  { %2713 = vmatmul.mubr.msk.f32.vlgmr.msra.gmra.mxu0 %vm251_vm4, %v1381_v20  ;;  %2721 = vmatprep.subr.mxu1 %v2978_v0 }
 0xf5b   :  { %2722 = vmatpush3.msra.mxu1 %v3079_v51  ;;  %2727 = vmatpush3.msra.mxu0 %v3119_v28 }
 0xf5c   :  { %2724 = vmatmul.mubr.msk.f32.vlgmr.msra.gmra.mxu1 %vm251_vm4, %v1381_v20  ;;  %2737 = vmatprep.subr.mxu1 %v2978_v0 }
 0xf5d   :  { %2728 = vmatprep.subr.mxu0 %v2978_v0  ;;  %2738 = vmatpush3.msra.mxu1 %v3059_v45 }
 0xf5e   :  { %2729 = vmatpush3.msra.mxu0 %v3121_v29  ;;  %2739 = vmatprep.subr.mxu1 %v2978_v0 }
 0xf5f   :  { %2730 = vmatprep.subr.mxu0 %v2978_v0  ;;  %2740 = vmatpush3.msra.mxu1 %v3063_v47 }
 0xf60   :  { %2731 = vmatpush3.msra.mxu0 %v3125_v21  ;;  %2741 = vmatprep.subr.mxu1 %v2978_v0 }
 0xf61   :  { %2732 = vmatprep.subr.mxu0 %v2978_v0  ;;  %2742 = vmatpush3.msra.mxu1 %v3071_v49 }
 0xf62   :  { %2733 = vmatpush3.msra.mxu0 %v3129_v30  ;;  %2743 = vmatprep.subr.mxu1 %v2978_v0 }
 0xf63   :  { %2744 = vmatpush3.msra.mxu1 %v3088_v54  ;;  %2745 = vmatprep.mubr.msk.f32.mxu1 %vm2979_vm0, %v2978_v0 }
 0xf64   :  { %2734 = vmatprep.mubr.msk.f32.mxu0 %vm2979_vm0, %v2978_v0  ;;  %2748 = vmatprep.subr.mxu0 %v2978_v0 }
 0xf65   :  { %2759 = vmatprep.subr.mxu1 %v2978_v0 }
0x1014   :  { %v1375_v25 = vpop.f32.mrf.mxu1 }
0x1016   :  { %v2703_v23 = vpop.f32.mrf.mxu1 }
0x101a   :  { %v1450_v24 = vpop.f32.mrf.mxu0 }
0x101b   :  { %v1451_v27 = vadd.f32 %v1450_v24, %v1375_v25 }
0x101c   :  { %v2714_v31 = vpop.f32.mrf.mxu0  ;;  %v1554_v22 = vpop.f32.mrf.mxu1 }
0x101d   :  { %v1454_v32 = vadd.f32 %v3107_v58, %v1451_v27  ;;  %v1555_v36 = vadd.f32 %v3024_v4, %v1554_v22 }
0x101e   :  { %v2725_v37 = vpop.f32.mrf.mxu1 }
0x101f   :  { %1566 = vrot.lane.b32.xlu0 %v1555_v36, %s2980_s25  ;;  %1462 = vrot.lane.b32.xlu1 %v1454_v32, %s2982_s26  ;;  %v1558_v38 = vadd.f32 %v1555_v36, %v3049_v33  ;;  %v2431_v39 = vmul.f32 -1.442695, %v1454_v32 }
0x1021   :  { %v2433_v40 = vmul.f32 -1.442695, %v1558_v38  ;;  %2879 = vpow2.f32 %v2431_v39 }
0x1023   :  { %2881 = vpow2.f32 %v2433_v40 }
0x102e   :  { %v2880_v41 = vpop.eup %2879 }
0x102f   :  { %v1458_v43 = vadd.f32 1.0, %v2880_v41 }
0x1030   :  { %v2882_v42 = vpop.eup %2881 }
0x1031   :  { %v1562_v44 = vadd.f32 1.0, %v2882_v42  ;;  %2883 = vrcp.f32 %v1458_v43 }
0x1033   :  { %2885 = vrcp.f32 %v1562_v44 }
0x103e   :  { %v2884_v52 = vpop.eup %2883 }
0x1040   :  { %v2886_v53 = vpop.eup %2885 }
0x1091   :  { %v1567_v4 = vpop.permute.xlu0 %1566  ;;  %v1463_v55 = vpop.permute.xlu1 %1462 }
0x1092   :  { %v1569_v56 = vmul.f32 %v2886_v53, %v1567_v4  ;;  %v1465_v57 = vmul.f32 %v2884_v52, %v1463_v55 }
0x1094   :  { %1571 = vrot.lane.b32.xlu0 %v1569_v56, %s2980_s25  ;;  %1467 = vrot.lane.b32.xlu1 %v1465_v57, %s2980_s25 }
0x1106   :  { %v1572_v59 = vpop.permute.xlu0 %1571  ;;  %v1468_v60 = vpop.permute.xlu1 %1467 }
0x1107   :  { %v1574_v61 = vadd.f32 %v1572_v59, %v3049_v33  ;;  %v1470_v62 = vadd.f32 %v1468_v60, %v1454_v32  ;;  %v2922_v59 = vld [vmem:[#allocation2 + $0x60] sm:$0xff]  ;;  %v2923_v60 = vld [vmem:[#allocation2 + $0x58] sm:$0xff] }
0x1109   :  { %2887 = vtanh.f32 %v1574_v61  ;;  %v2924_v61 = vld [vmem:[#allocation2 + $0x50] sm:$0xff] }
0x110a   :  { %2889 = vtanh.f32 %v1470_v62 }
0x1116   :  { %v2888_v63 = vpop.eup %2887 }
0x1117   :  { %v2890_v1 = vpop.eup %2889  ;;  %v1576_v2 = vsub.f32 %v3306_v18, %v2888_v63 }
0x1118   :  { %v1472_v3 = vsub.f32 %v3302_v16, %v2890_v1 }
0x1119   :  { %1578 = vrot.lane.b32.xlu0 %v1576_v2, %s2981_s0  ;;  %v2927_v2 = vld [vmem:[#allocation2 + $0x10] sm:$0xff] }
0x111a   :  { %1474 = vrot.lane.b32.xlu1 %v1472_v3, %s2981_s0  ;;  %v2929_v3 = vld [vmem:[#allocation2] sm:$0xff] }
0x118b   :  { %v1579_v5 = vpop.permute.xlu0 %1578 }
0x118c   :  { %v1581_v6 = vmul.f32 %v2886_v53, %v1579_v5  ;;  %v1475_v7 = vpop.permute.xlu1 %1474 }
0x118d   :  { %v1477_v8 = vmul.f32 %v2884_v52, %v1475_v7 }
0x118e   :  { %1583 = vrot.lane.b32.xlu0 %v1581_v6, %s2982_s26 }
0x118f   :  { %1479 = vrot.lane.b32.xlu1 %v1477_v8, %s2982_s26 }
0x1200   :  { %v1584_v33 = vpop.permute.xlu0 %1583 }
0x1201   :  { %v3357_v9 = vadd.f32 %v2888_v63, %v1584_v33  ;;  %v1480_v10 = vpop.permute.xlu1 %1479  ;;  %v2925_v63 = vld [vmem:[#allocation2 + $0x48] sm:$0xff]  ;;  %v2930_v33 = vld [vmem:[#allocation2 + $0x40] ss:$0 sm:$0xff] }
0x1202   :  { %v3359_v11 = vadd.f32 %v2890_v1, %v1480_v10  ;;  %v2926_v1 = vld [vmem:[#allocation2 + $0x18] sm:$0xff] }
0x1203   :  { %1663 = vrot.lane.b32.xlu0 %v3357_v9, %s2980_s25 }
0x1204   :  { %1588 = vrot.lane.b32.xlu1 %v3359_v11, %s2980_s25 }
0x1275   :  { %v1664_v12 = vpop.permute.xlu0 %1663 }
0x1276   :  { %v1589_v13 = vpop.permute.xlu1 %1588  ;;  %2746 = vmatmul.mubr.msk.f32.vlgmr.msra.gmra.mxu1 %vm251_vm4, %v1664_v12 }
0x1277   :  { %2735 = vmatmul.mubr.msk.f32.vlgmr.msra.gmra.mxu0 %vm251_vm4, %v1589_v13  ;;  %2760 = vmatpush3.msra.mxu1 %v3119_v28 }
0x1278   :  { %2749 = vmatpush3.msra.mxu0 %v3061_v46  ;;  %2756 = vmatprep.mubr.msk.f32.mxu0 %vm2979_vm0, %v2978_v0 }
0x1279   :  { %2750 = vmatprep.subr.mxu0 %v2978_v0  ;;  %2761 = vmatprep.subr.mxu1 %v2978_v0 }
0x127a   :  { %2751 = vmatpush3.msra.mxu0 %v3067_v48  ;;  %2762 = vmatpush3.msra.mxu1 %v3121_v29 }
0x127b   :  { %2752 = vmatprep.subr.mxu0 %v2978_v0  ;;  %2763 = vmatprep.subr.mxu1 %v2978_v0 }
0x127c   :  { %2753 = vmatpush3.msra.mxu0 %v3073_v50  ;;  %2764 = vmatpush3.msra.mxu1 %v3125_v21 }
0x127d   :  { %2754 = vmatprep.subr.mxu0 %v2978_v0  ;;  %2765 = vmatprep.subr.mxu1 %v2978_v0 }
0x127e   :  { %2755 = vmatpush3.msra.mxu0 %v3079_v51  ;;  %2766 = vmatpush3.msra.mxu1 %v3129_v30 }
0x127f   :  { %2757 = vmatmul.mubr.msk.f32.vlgmr.msra.gmra.mxu0 %vm251_vm4, %v1664_v12  ;;  %2770 = vmatprep.subr.mxu0 %v2978_v0 }
0x1280   :  { %2771 = vmatpush3.msra.mxu0 %v3059_v45  ;;  %2767 = vmatprep.mubr.msk.f32.mxu1 %vm2979_vm0, %v2978_v0 }
0x1281   :  { %2772 = vmatprep.subr.mxu0 %v2978_v0  ;;  %2781 = vmatprep.subr.mxu1 %v2978_v0 }
0x1282   :  { %2773 = vmatpush3.msra.mxu0 %v3063_v47  ;;  %2778 = vmatprep.mubr.msk.f32.mxu0 %vm2979_vm0, %v2978_v0 }
0x1283   :  { %2774 = vmatprep.subr.mxu0 %v2978_v0 }
0x1284   :  { %2775 = vmatpush3.msra.mxu0 %v3071_v49 }
0x1285   :  { %2776 = vmatprep.subr.mxu0 %v2978_v0 }
0x1286   :  { %2777 = vmatpush3.msra.mxu0 %v3088_v54 }
0x1287   :  { %2792 = vmatprep.subr.mxu0 %v2978_v0 }
0x1336   :  { %v1733_v45 = vpop.f32.mrf.mxu1 }
0x1337   :  { %v1658_v46 = vpop.f32.mrf.mxu0 }
0x1338   :  { %v1734_v48 = vadd.f32 %v1733_v45, %v1658_v46  ;;  %v2747_v50 = vpop.f32.mrf.mxu1 }
0x1339   :  { %v2736_v51 = vpop.f32.mrf.mxu0 }
0x133a   :  { %v1737_v47 = vadd.f32 %v3107_v58, %v1734_v48 }
0x133c   :  { %1745 = vrot.lane.b32.xlu1 %v1737_v47, %s2982_s26  ;;  %v2436_v54 = vmul.f32 -1.442695, %v1737_v47 }
0x133e   :  { %2891 = vpow2.f32 %v2436_v54 }
0x133f   :  { %v1837_v14 = vpop.f32.mrf.mxu0 }
0x1340   :  { %v1838_v49 = vadd.f32 %v3400_v15, %v1837_v14 }
0x1341   :  { %v2758_v26 = vpop.f32.mrf.mxu0 }
0x1342   :  { %1849 = vrot.lane.b32.xlu0 %v1838_v49, %s2980_s25  ;;  %v1841_v16 = vadd.f32 %v1838_v49, %v3052_v34 }
0x1344   :  { %v2438_v17 = vmul.f32 -1.442695, %v1841_v16 }
0x1346   :  { %2893 = vpow2.f32 %v2438_v17 }
0x134b   :  { %v2892_v18 = vpop.eup %2891 }
0x134c   :  { %v1741_v19 = vadd.f32 1.0, %v2892_v18 }
0x134e   :  { %2895 = vrcp.f32 %v1741_v19 }
0x1353   :  { %v2894_v20 = vpop.eup %2893 }
0x1354   :  { %v1845_v58 = vadd.f32 1.0, %v2894_v20 }
0x1356   :  { %2897 = vrcp.f32 %v1845_v58 }
0x135b   :  { %v2896_v25 = vpop.eup %2895 }
0x1363   :  { %v2898_v27 = vpop.eup %2897 }
0x13ae   :  { %v1746_v23 = vpop.permute.xlu1 %1745 }
0x13af   :  { %v1748_v24 = vmul.f32 %v2896_v25, %v1746_v23 }
0x13b1   :  { %1750 = vrot.lane.b32.xlu1 %v1748_v24, %s2980_s25 }
0x13b4   :  { %v1850_v31 = vpop.permute.xlu0 %1849 }
0x13b5   :  { %v1852_v22 = vmul.f32 %v2898_v27, %v1850_v31 }
0x13b7   :  { %1854 = vrot.lane.b32.xlu0 %v1852_v22, %s2980_s25 }
0x1423   :  { %v1751_v32 = vpop.permute.xlu1 %1750 }
0x1424   :  { %v1753_v36 = vadd.f32 %v1751_v32, %v1737_v47 }
0x1426   :  { %2899 = vtanh.f32 %v1753_v36 }
0x1429   :  { %v1855_v37 = vpop.permute.xlu0 %1854 }
0x142a   :  { %v1857_v38 = vadd.f32 %v1855_v37, %v3052_v34 }
0x142c   :  { %2901 = vtanh.f32 %v1857_v38 }
0x1433   :  { %v2900_v39 = vpop.eup %2899 }
0x1434   :  { %v1755_v40 = vsub.f32 %v3359_v11, %v2900_v39 }
0x1436   :  { %1757 = vrot.lane.b32.xlu1 %v1755_v40, %s2981_s0 }
0x1439   :  { %v2902_v41 = vpop.eup %2901 }
0x143a   :  { %v1859_v42 = vsub.f32 %v3357_v9, %v2902_v41 }
0x143c   :  { %1861 = vrot.lane.b32.xlu0 %v1859_v42, %s2981_s0 }
0x14a8   :  { %v1758_v43 = vpop.permute.xlu1 %1757 }
0x14a9   :  { %v1760_v44 = vmul.f32 %v2896_v25, %v1758_v43 }
0x14ab   :  { %1762 = vrot.lane.b32.xlu1 %v1760_v44, %s2982_s26 }
0x14ae   :  { %v1862_v52 = vpop.permute.xlu0 %1861 }
0x14af   :  { %v1864_v53 = vmul.f32 %v2898_v27, %v1862_v52 }
0x14b1   :  { %1866 = vrot.lane.b32.xlu0 %v1864_v53, %s2982_s26 }
0x151d   :  { %v1763_v34 = vpop.permute.xlu1 %1762 }
0x151e   :  { %v3414_v4 = vadd.f32 %v2900_v39, %v1763_v34 }
0x1520   :  { %1871 = vrot.lane.b32.xlu1 %v3414_v4, %s2980_s25 }
0x1523   :  { %v1867_v55 = vpop.permute.xlu0 %1866 }
0x1524   :  { %v3418_v56 = vadd.f32 %v2902_v41, %v1867_v55 }
0x1526   :  { %1946 = vrot.lane.b32.xlu0 %v3418_v56, %s2980_s25 }
0x1592   :  { %v1872_v57 = vpop.permute.xlu1 %1871 }
0x1593   :  { %2768 = vmatmul.mubr.msk.f32.vlgmr.msra.gmra.mxu1 %vm251_vm4, %v1872_v57 }
0x1594   :  { %2782 = vmatpush3.msra.mxu1 %v2922_v59  ;;  %2789 = vmatprep.mubr.msk.f32.mxu1 %vm2979_vm0, %v2978_v0 }
0x1595   :  { %2783 = vmatprep.subr.mxu1 %v2978_v0 }
0x1596   :  { %2784 = vmatpush3.msra.mxu1 %v2923_v60 }
0x1597   :  { %2785 = vmatprep.subr.mxu1 %v2978_v0 }
0x1598   :  { %2786 = vmatpush3.msra.mxu1 %v2924_v61  ;;  %v1947_v62 = vpop.permute.xlu0 %1946  ;;  %v2447_v61 = vld [vmem:[#allocation2 + $0x43] ss:$0 sm:$0xff] }
0x1599   :  { %2779 = vmatmul.mubr.msk.f32.vlgmr.msra.gmra.mxu0 %vm251_vm4, %v1947_v62  ;;  %2787 = vmatprep.subr.mxu1 %v2978_v0 }
0x159a   :  { %2788 = vmatpush3.msra.mxu1 %v2925_v63  ;;  %2793 = vmatpush3.msra.mxu0 %v3119_v28  ;;  %v2928_v28 = vld [vmem:[#allocation2 + $0x8] sm:$0xff] }
0x159b   :  { %2790 = vmatmul.mubr.msk.f32.vlgmr.msra.gmra.mxu1 %vm251_vm4, %v1947_v62  ;;  %2803 = vmatprep.subr.mxu1 %v2978_v0 }
0x159c   :  { %2804 = vmatpush3.msra.mxu1 %v2926_v1  ;;  %2794 = vmatprep.subr.mxu0 %v2978_v0 }
0x159d   :  { %2805 = vmatprep.subr.mxu1 %v2978_v0  ;;  %2795 = vmatpush3.msra.mxu0 %v3121_v29 }
0x159e   :  { %2806 = vmatpush3.msra.mxu1 %v2927_v2  ;;  %2796 = vmatprep.subr.mxu0 %v2978_v0 }
0x159f   :  { %2807 = vmatprep.subr.mxu1 %v2978_v0  ;;  %2797 = vmatpush3.msra.mxu0 %v3125_v21 }
0x15a0   :  { %2808 = vmatpush3.msra.mxu1 %v2928_v28  ;;  %2798 = vmatprep.subr.mxu0 %v2978_v0 }
0x15a1   :  { %2809 = vmatprep.subr.mxu1 %v2978_v0  ;;  %2811 = vmatprep.mubr.msk.f32.mxu1 %vm2979_vm0, %v2978_v0 }
0x15a2   :  { %2810 = vmatpush3.msra.mxu1 %v2929_v3  ;;  %2799 = vmatpush3.msra.mxu0 %v3129_v30 }
0x15a3   :  { %2800 = vmatprep.mubr.msk.f32.mxu0 %vm2979_vm0, %v2978_v0 }
0x1653   :  { %v1941_v29 = vpop.f32.mrf.mxu1 }
0x1655   :  { %v2769_v5 = vpop.f32.mrf.mxu1 }
0x1659   :  { %v2016_v6 = vpop.f32.mrf.mxu0 }
0x165a   :  { %v2017_v21 = vadd.f32 %v2016_v6, %v1941_v29  ;;  %v2356_v29 = vld [vmem:[%s3481_s1] sm:$0x3]  ;;  %s2983_s1 = smov [#allocation5]  }
0x165b   :  { %v2780_v7 = vpop.f32.mrf.mxu0  ;;  %v2120_v8 = vpop.f32.mrf.mxu1  ;;  %s2388_s5 = sshll.u32 %s2983_s1, 4  ;;  %s2389_s5 = int_to_ptr.vmem [resolvable:$true] %s2388_s5 }
0x165c   :  { %v2020_v9 = vadd.f32 %v2930_v33, %v2017_v21  ;;  %v2121_v10 = vadd.f32 %v3400_v15, %v2120_v8  ;;  %s2955_s7 = scalar_lea.vmem %s2389_s5, 32  ;;  %p2956_p6 = scmp.lt.s32.totalorder %s2389_s5, %s2389_s5 }
0x165d   :  { %v2791_v11 = vpop.f32.mrf.mxu1 }
0x165e   :  { %2132 = vrot.lane.b32.xlu0 %v2121_v10, %s2980_s25  ;;  %2028 = vrot.lane.b32.xlu1 %v2020_v9, %s2982_s26  ;;  %v2124_v30 = vadd.f32 %v2121_v10, %v3055_v35  ;;  %v2441_v12 = vmul.f32 -1.442695, %v2020_v9 }
0x1660   :  { %v2443_v13 = vmul.f32 -1.442695, %v2124_v30  ;;  %2903 = vpow2.f32 %v2441_v12 }
0x1662   :  { %2905 = vpow2.f32 %v2443_v13 }
0x166d   :  { %v2904_v0 = vpop.eup %2903 }
0x166e   :  { %v2024_v46 = vadd.f32 1.0, %v2904_v0 }
0x166f   :  { %v2906_v45 = vpop.eup %2905 }
0x1670   :  { %v2128_v48 = vadd.f32 1.0, %v2906_v45  ;;  %2907 = vrcp.f32 %v2024_v46 }
0x1672   :  { %2909 = vrcp.f32 %v2128_v48 }
0x167d   :  { %v2908_v50 = vpop.eup %2907 }
0x167f   :  { %v2910_v51 = vpop.eup %2909 }
0x16d0   :  { %v2133_v47 = vpop.permute.xlu0 %2132  ;;  %v2029_v14 = vpop.permute.xlu1 %2028 }
0x16d1   :  { %v2135_v15 = vmul.f32 %v2910_v51, %v2133_v47  ;;  %v2031_v49 = vmul.f32 %v2908_v50, %v2029_v14 }
0x16d3   :  { %2137 = vrot.lane.b32.xlu0 %v2135_v15, %s2980_s25  ;;  %2033 = vrot.lane.b32.xlu1 %v2031_v49, %s2980_s25 }
0x1745   :  { %v2138_v26 = vpop.permute.xlu0 %2137  ;;  %v2034_v54 = vpop.permute.xlu1 %2033 }
0x1746   :  { %v2140_v16 = vadd.f32 %v2138_v26, %v3055_v35  ;;  %v2036_v17 = vadd.f32 %v2034_v54, %v2020_v9 }
0x1748   :  { %2911 = vtanh.f32 %v2140_v16 }
0x1749   :  { %2913 = vtanh.f32 %v2036_v17 }
0x1755   :  { %v2912_v18 = vpop.eup %2911 }
0x1756   :  { %v2914_v19 = vpop.eup %2913  ;;  %v2142_v20 = vsub.f32 %v3418_v56, %v2912_v18 }
0x1757   :  { %v2038_v58 = vsub.f32 %v3414_v4, %v2914_v19 }
0x1758   :  { %2144 = vrot.lane.b32.xlu0 %v2142_v20, %s2981_s0 }
0x1759   :  { %2040 = vrot.lane.b32.xlu1 %v2038_v58, %s2981_s0 }
0x17ca   :  { %v2145_v25 = vpop.permute.xlu0 %2144 }
0x17cb   :  { %v2147_v23 = vmul.f32 %v2910_v51, %v2145_v25  ;;  %v2041_v24 = vpop.permute.xlu1 %2040 }
0x17cc   :  { %v2043_v27 = vmul.f32 %v2908_v50, %v2041_v24 }
0x17cd   :  { %2149 = vrot.lane.b32.xlu0 %v2147_v23, %s2982_s26 }
0x17ce   :  { %2045 = vrot.lane.b32.xlu1 %v2043_v27, %s2982_s26 }
0x183f   :  { %v2150_v35 = vpop.permute.xlu0 %2149 }
0x1840   :  { %v2152_v31 = vadd.f32 %v2912_v18, %v2150_v35  ;;  %v2046_v22 = vpop.permute.xlu1 %2045 }
0x1841   :  { %v2048_v32 = vadd.f32 %v2914_v19, %v2046_v22 }
0x1842   :  { %2229 = vrot.lane.b32.xlu0 %v2152_v31, %s2980_s25 }
0x1843   :  { %2154 = vrot.lane.b32.xlu1 %v2048_v32, %s2980_s25 }
0x18b4   :  { %v2230_v36 = vpop.permute.xlu0 %2229 }
0x18b5   :  { %v2155_v37 = vpop.permute.xlu1 %2154  ;;  %2812 = vmatmul.mubr.msk.f32.vlgmr.msra.gmra.mxu1 %vm251_vm4, %v2230_v36 }
0x18b6   :  { %2801 = vmatmul.mubr.msk.f32.vlgmr.msra.gmra.mxu0 %vm251_vm4, %v2155_v37 }
0x1975   :  { %v2299_v38 = vpop.f32.mrf.mxu1 }
0x1976   :  { %v2224_v39 = vpop.f32.mrf.mxu0 }
0x1977   :  { %v2300_v40 = vadd.f32 %v2299_v38, %v2224_v39  ;;  %v2813_v41 = vpop.f32.mrf.mxu1 }
0x1978   :  { %v2802_v42 = vpop.f32.mrf.mxu0 }
0x1979   :  { %v2303_v43 = vadd.f32 %v2930_v33, %v2300_v40 }
0x197b   :  { %2311 = vrot.lane.b32.xlu1 %v2303_v43, %s2982_s26  ;;  %v2446_v44 = vmul.f32 -1.442695, %v2303_v43 }
0x197d   :  { %2915 = vpow2.f32 %v2446_v44 }
0x198a   :  { %v2916_v52 = vpop.eup %2915 }
0x198b   :  { %v2307_v53 = vadd.f32 1.0, %v2916_v52 }
0x198d   :  { %2917 = vrcp.f32 %v2307_v53 }
0x199a   :  { %v2918_v34 = vpop.eup %2917 }
0x19ed   :  { %v2312_v4 = vpop.permute.xlu1 %2311 }
0x19ee   :  { %v2314_v55 = vmul.f32 %v2918_v34, %v2312_v4 }
0x19f0   :  { %2316 = vrot.lane.b32.xlu0 %v2314_v55, %s2980_s25 }
0x1a62   :  { %v2317_v56 = vpop.permute.xlu0 %2316 }
0x1a63   :  { %v2319_v57 = vadd.f32 %v2317_v56, %v2303_v43 }
0x1a65   :  { %2919 = vtanh.f32 %v2319_v57 }
0x1a72   :  { %v2920_v59 = vpop.eup %2919 }
0x1a73   :  { %v2321_v60 = vsub.f32 %v2048_v32, %v2920_v59 }
0x1a75   :  { %2323 = vrot.lane.b32.xlu1 %v2321_v60, %s2981_s0 }
0x1a79   :  { %2337 = vrot.lane.b32.xlu1 %v2447_v61, %s2980_s25 }
0x1ae7   :  { %v2324_v62 = vpop.permute.xlu1 %2323 }
0x1ae8   :  { %v2326_v63 = vmul.f32 %v2918_v34, %v2324_v62 }
0x1aea   :  { %2328 = vrot.lane.b32.xlu0 %v2326_v63, %s2982_s26 }
0x1aeb   :  { %v2338_v2 = vpop.permute.xlu1 %2337 }
0x1b5c   :  { %v2329_v1 = vpop.permute.xlu0 %2328 }
0x1b5d   :  { %v2331_v28 = vadd.f32 %v2920_v59, %v2329_v1 }
0x1b5f   :  { %v2340_v3 = vmul.f32 %v2338_v2, %v2331_v28 }
0x1b61   :  { %2342 = vrot.lane.b32.xlu0 %v2340_v3, %s2980_s25 }
0x1b65   :  { %2358 = vrot.lane.b32.xlu0 %v2356_v29, %s2982_s26 }
0x1bd3   :  { %v2343_v5 = vpop.permute.xlu0 %2342 }
0x1bd4   :  { %v2346_v6 = vsel %vm2345_vm5, %v2343_v5, 0.0 }
0x1bd5   :  { %2347 = vadd.xlane.f32.xlu1 %v2346_v6 }
0x1bd7   :  { %v2359_v7 = vpop.permute.xlu0 %2358 }
0x1c5e   :  { %v2348_v21 = vpop.xlane.xlu1 %2347 }
0x1c5f   :  { %v2349_v8 = vadd.f32 %v2447_v61, %v2348_v21 }
0x1c61   :  { %v2361_v33 = vsub.f32 %v2349_v8, %v2359_v7  ;;  %2351 = vrot.lane.b32.xlu1 %v2349_v8, %s2981_s0 }
0x1c63   :  { %v2362_v9 = vmul.f32 %v2361_v33, %v2361_v33 }
0x1c65   :  { %2364 = vrot.lane.b32.xlu0 %v2362_v9, %s2981_s0 }
0x1cd3   :  { %v2352_v10 = vpop.permute.xlu1 %2351 }
0x1cd4   :  { %2355 = vst.msk [vmem:[%s3484_s4] sm:$0x3] %vm2354_vm6, %v2352_v10  ;;  %s2951_s4 = scalar_lea.vmem %s2389_s5, 16 }
0x1cd5   :  { %p2952_p5 = scmp.ne.s32.totalorder %s2389_s5, %s2951_s4  ;;  %p2957_p7 = scmp.lt.s32.totalorder %s2955_s7, %s2951_s4 }
0x1cd7   :  { %v2365_v11 = vpop.permute.xlu0 %2364  ;;  %p2958_p8 = por %p2957_p7, %p2956_p6 }
0x1cd8   :  { %v2367_v30 = vsel %vm2354_vm6, %v2365_v11, 0.0 }
0x1cd9   :  { %2368 = vadd.xlane.f32.xlu0 %v2367_v30  ;;  %p2959_p9 = pnand %p2958_p8, %p2952_p5 }
0x1d62   :  { %v2369_v12 = vpop.xlane.xlu0 %2368 }
0x1d63   :  { %v2370_v13 = vrot.slane %v2369_v12, 4 }
0x1d65   :  { %v2371_v0 = vadd.f32 %v2370_v13, %v2369_v12 }
0x1d67   :  { %v2372_v45 = vrot.slane %v2371_v0, 2 }
0x1d69   :  { %v2373_v46 = vadd.f32 %v2372_v45, %v2371_v0 }
0x1d6b   :  { %v2374_v48 = vrot.slane %v2373_v46, 1 }
0x1d6d   :  { %v2375_v50 = vadd.f32 %v2374_v48, %v2373_v46 }
0x1d6f   :  { %2814 = vpush %v2375_v50 }
0x1da0   :  { %s2815_s6 = spop %2814 }
0x1da1   :  { %v2377_v51 = vstv %s2815_s6 }
0x1da2   :  { %v2379_v47 = vmul.f32 0.5, %v2377_v51 }
0x1da4   :  { %2381 = vst.msk [vmem:[#allocation5] sm:$0x1] %vm2380_vm7, %v2379_v47 }
0x1da5   :  { %2962 = shalt.err (!%p2959_p9)
}
0x1da6   :  { %2391 = dma.vmem_to_hbm [thread:$0]  %s2389_s5, 16, %s3483_s3, [#allocation4]  }
0x1da7   :  { %2973 = dma.done.wait [#allocation4], 16  }
0x1da8   :  { %2974 = vsyncadd [#allocation4], 4294967280 }
0x1da9   :  { %2399 = vsyncpa [#allocation3], 1 }
0x1daa   :  { %2400 = vsyncpa [#allocation4], 1 }

</bundles_post_ra>
